<compile_context>
chip_gen: v6e
topology: v6e:2x2x1
jax: 0.10.0
libtpu: 0.0.40
codegen_flags: <defaults>
</compile_context>

<pallas_src>
import math
import functools

import jax
import jax.numpy as jnp
from jax import lax
from jax.experimental import pallas as pl
from jax.experimental.pallas import tpu as pltpu


# ----------------------------------------------------------------------------
# helpers
# ----------------------------------------------------------------------------
def _choose_tile(S, max_tile=256):
    """Largest tile <= max_tile that divides S and is a multiple of 8 (or S itself)."""
    if S <= max_tile:
        return S
    for t in range(max_tile, 7, -1):
        if S % t == 0 and t % 8 == 0:
            return t
    return S


# ----------------------------------------------------------------------------
# Kernel 1: multi-head self-attention + residual + LayerNorm (fused epilogue)
# grid = (B, num_query_tiles)
# ----------------------------------------------------------------------------
def _attn_ln_kernel(n_heads, d_head, q_tile,
                    vl_ref,                                     # scalar prefetch (B,) int32 (SMEM)
                    x_ref,                                      # (1, S, D) bf16
                    wq_ref, bq_ref, wk_ref, bk_ref, wv_ref, bv_ref,  # (H,D,dh) / (H,1,dh)
                    wo_ref, bo_ref,                             # (H,dh,D) / (1,D)
                    gamma_ref, beta_ref,                        # (1,D) f32
                    o_ref):                                     # (1, TQ, D)
    H, dh, TQ = n_heads, d_head, q_tile
    S = x_ref.shape[1]
    D = x_ref.shape[2]
    cdt = x_ref.dtype                                           # MXU compute dtype (bf16)

    b = pl.program_id(0)
    qi = pl.program_id(1)
    q0 = pl.multiple_of(qi * TQ, TQ)
    vlen = vl_ref[b]                                            # scalar read before heavy work

    xf = x_ref[0]                                               # (S, D)   keys/values source
    xq = x_ref[0, pl.ds(q0, TQ), :]                             # (TQ, D)  queries + residual

    # --- per-head projections as batched matmuls (contraction over full D) ---
    xq_b = jnp.broadcast_to(xq, (H, TQ, D))
    xf_b = jnp.broadcast_to(xf, (H, S, D))
    qh = jnp.einsum('hqd,hde->hqe', xq_b, wq_ref[...],
                    preferred_element_type=jnp.float32) + bq_ref[...]
    kh = jnp.einsum('hkd,hde->hke', xf_b, wk_ref[...],
                    preferred_element_type=jnp.float32) + bk_ref[...]
    vh = jnp.einsum('hkd,hde->hke', xf_b, wv_ref[...],
                    preferred_element_type=jnp.float32) + bv_ref[...]

    # --- scaled dot-product attention with in-kernel padding mask ---
    scale = 1.0 / math.sqrt(dh)
    s = jnp.einsum('hqe,hke->hqk', qh.astype(cdt), kh.astype(cdt),
                   preferred_element_type=jnp.float32) * scale  # (H, TQ, S) f32
    key_ids = lax.broadcasted_iota(jnp.int32, (H, TQ, S), 2)
    s = jnp.where(key_ids < vlen, s, -10000.0)                  # masked_fill(mask==0, -1e4)

    m = jnp.max(s, axis=-1, keepdims=True)
    p = jnp.exp(s - m)
    denom = jnp.sum(p, axis=-1, keepdims=True)
    probs = p * pl.reciprocal(denom, approx=True)               # EUP reciprocal

    ctx = jnp.einsum('hqk,hke->hqe', probs.astype(cdt), vh.astype(cdt),
                     preferred_element_type=jnp.float32)        # (H, TQ, dh)

    # --- output projection: per-head partials summed over heads (no concat) ---
    out_h = jnp.einsum('hqe,hed->hqd', ctx.astype(cdt), wo_ref[...],
                       preferred_element_type=jnp.float32)      # (H, TQ, D)
    attn = jnp.sum(out_h, axis=0) + bo_ref[...].astype(jnp.float32)   # (TQ, D) f32

    # --- fused residual add + LayerNorm (eps=1e-12, biased variance) ---
    y = attn + xq.astype(jnp.float32)
    mean = jnp.mean(y, axis=-1, keepdims=True)
    var = jnp.mean((y - mean) ** 2, axis=-1, keepdims=True)
    yn = (y - mean) * lax.rsqrt(var + 1e-12)
    o_ref[0] = (yn * gamma_ref[...] + beta_ref[...]).astype(o_ref.dtype)


# ----------------------------------------------------------------------------
# Kernel 2: position-wise feed-forward + residual + LayerNorm (fused epilogue)
# grid = (B, num_row_tiles)
# ----------------------------------------------------------------------------
def _ffn_ln_kernel(x_ref, w1_ref, b1_ref, w2_ref, b2_ref, gamma_ref, beta_ref, o_ref):
    x = x_ref[0]                                                # (TS, D) bf16
    h = jnp.dot(x, w1_ref[...], preferred_element_type=jnp.float32) \
        + b1_ref[...].astype(jnp.float32)
    h = jnp.maximum(h, 0.0)                                     # ReLU
    out = jnp.dot(h.astype(x_ref.dtype), w2_ref[...],
                  preferred_element_type=jnp.float32) + b2_ref[...].astype(jnp.float32)
    y = out + x.astype(jnp.float32)                             # residual
    mean = jnp.mean(y, axis=-1, keepdims=True)
    var = jnp.mean((y - mean) ** 2, axis=-1, keepdims=True)
    yn = (y - mean) * lax.rsqrt(var + 1e-12)
    o_ref[0] = (yn * gamma_ref[...] + beta_ref[...]).astype(o_ref.dtype)


# ----------------------------------------------------------------------------
# pallas_call wrappers
# ----------------------------------------------------------------------------
def attention_block(x, valid_len, wq_h, bq_h, wk_h, bk_h, wv_h, bv_h, wo_h, bo,
                    gamma, beta, *, n_heads, q_tile=None):
    B, S, D = x.shape
    dh = D // n_heads
    TQ = q_tile or _choose_tile(S)
    assert S % TQ == 0
    nq = S // TQ

    winv3 = lambda shape: pl.BlockSpec(shape, lambda b, q, vl: (0, 0, 0))
    winv2 = lambda shape: pl.BlockSpec(shape, lambda b, q, vl: (0, 0))

    kern = functools.partial(_attn_ln_kernel, n_heads, dh, TQ)
    return pl.pallas_call(
        kern,
        out_shape=jax.ShapeDtypeStruct((B, S, D), x.dtype),
        grid_spec=pltpu.PrefetchScalarGridSpec(
            num_scalar_prefetch=1,
            grid=(B, nq),
            in_specs=[
                pl.BlockSpec((1, S, D), lambda b, q, vl: (b, 0, 0)),   # x (K/V source + queries)
                winv3((n_heads, D, dh)), winv3((n_heads, 1, dh)),      # Wq, bq
                winv3((n_heads, D, dh)), winv3((n_heads, 1, dh)),      # Wk, bk
                winv3((n_heads, D, dh)), winv3((n_heads, 1, dh)),      # Wv, bv
                winv3((n_heads, dh, D)), winv2((1, D)),                # Wo, bo
                winv2((1, D)), winv2((1, D)),                          # gamma1, beta1
            ],
            out_specs=pl.BlockSpec((1, TQ, D), lambda b, q, vl: (b, q, 0)),
        ),
        compiler_params=pltpu.CompilerParams(
            dimension_semantics=("parallel", "parallel"),
            vmem_limit_bytes=64 * 1024 * 1024,
        ),
    )(valid_len, x, wq_h, bq_h, wk_h, bk_h, wv_h, bv_h, wo_h, bo, gamma, beta)


def ffn_block(x, w1, b1, w2, b2, gamma, beta, *, s_tile=None):
    B, S, D = x.shape
    F = w1.shape[1]
    TS = s_tile or _choose_tile(S)
    assert S % TS == 0
    ns = S // TS

    return pl.pallas_call(
        _ffn_ln_kernel,
        out_shape=jax.ShapeDtypeStruct((B, S, D), x.dtype),
        grid_spec=pltpu.PrefetchScalarGridSpec(
            num_scalar_prefetch=0,
            grid=(B, ns),
            in_specs=[
                pl.BlockSpec((1, TS, D), lambda b, s: (b, s, 0)),
                pl.BlockSpec((D, F), lambda b, s: (0, 0)),
                pl.BlockSpec((1, F), lambda b, s: (0, 0)),
                pl.BlockSpec((F, D), lambda b, s: (0, 0)),
                pl.BlockSpec((1, D), lambda b, s: (0, 0)),
                pl.BlockSpec((1, D), lambda b, s: (0, 0)),
                pl.BlockSpec((1, D), lambda b, s: (0, 0)),
            ],
            out_specs=pl.BlockSpec((1, TS, D), lambda b, s: (b, s, 0)),
        ),
        compiler_params=pltpu.CompilerParams(
            dimension_semantics=("parallel", "parallel"),
            vmem_limit_bytes=64 * 1024 * 1024,
        ),
    )(x, w1, b1, w2, b2, gamma, beta)


# ----------------------------------------------------------------------------
# EncoderLayer forward (dropout = identity / inference mode)
# ----------------------------------------------------------------------------
def encoder_layer(params, x, valid_len, *, n_heads):
    p = params
    D = x.shape[-1]
    dh = D // n_heads

    # reshape packed projection weights into per-head form (host-side, free under jit)
    wq_h = p["wq"].reshape(D, n_heads, dh).transpose(1, 0, 2)   # (H, D, dh)
    wk_h = p["wk"].reshape(D, n_heads, dh).transpose(1, 0, 2)
    wv_h = p["wv"].reshape(D, n_heads, dh).transpose(1, 0, 2)
    wo_h = p["wo"].reshape(n_heads, dh, D)                      # (H, dh, D)
    bq_h = p["bq"].reshape(n_heads, 1, dh)
    bk_h = p["bk"].reshape(n_heads, 1, dh)
    bv_h = p["bv"].reshape(n_heads, 1, dh)

    # self-attention + dropout1(identity) + norm1(x + residual)   [fused kernel 1]
    x = attention_block(x, valid_len,
                        wq_h, bq_h, wk_h, bk_h, wv_h, bv_h, wo_h, p["bo"],
                        p["gamma1"], p["beta1"], n_heads=n_heads)
    # FFN + dropout2(identity) + norm2(x + residual)              [fused kernel 2]
    x = ffn_block(x, p["w1"], p["b1"], p["w2"], p["b2"], p["gamma2"], p["beta2"])
    return x


def init_params(key, d_model, ffn_hidden):
    keys = jax.random.split(key, 12)
    s = 0.02
    D, F = d_model, ffn_hidden
    wdt = jnp.bfloat16
    return {
        "wq": (s * jax.random.normal(keys[0], (D, D), jnp.float32)).astype(wdt),
        "bq": (s * jax.random.normal(keys[1], (1, D), jnp.float32)).astype(wdt),
        "wk": (s * jax.random.normal(keys[2], (D, D), jnp.float32)).astype(wdt),
        "bk": (s * jax.random.normal(keys[3], (1, D), jnp.float32)).astype(wdt),
        "wv": (s * jax.random.normal(keys[4], (D, D), jnp.float32)).astype(wdt),
        "bv": (s * jax.random.normal(keys[5], (1, D), jnp.float32)).astype(wdt),
        "wo": (s * jax.random.normal(keys[6], (D, D), jnp.float32)).astype(wdt),
        "bo": (s * jax.random.normal(keys[7], (1, D), jnp.float32)).astype(wdt),
        "gamma1": jnp.ones((1, D), jnp.float32),
        "beta1": jnp.zeros((1, D), jnp.float32),
        "w1": (s * jax.random.normal(keys[8], (D, F), jnp.float32)).astype(wdt),
        "b1": (s * jax.random.normal(keys[9], (1, F), jnp.float32)).astype(wdt),
        "w2": (s * jax.random.normal(keys[10], (F, D), jnp.float32)).astype(wdt),
        "b2": (s * jax.random.normal(keys[11], (1, D), jnp.float32)).astype(wdt),
        "gamma2": jnp.ones((1, D), jnp.float32),
        "beta2": jnp.zeros((1, D), jnp.float32),
    }


if __name__ == "__main__":
    B, S, D, H, F = 2, 8, 32, 4, 64   # batch, seq, d_model, n_heads, ffn_hidden

    key = jax.random.PRNGKey(0)
    k_param, k_x = jax.random.split(key)
    params = init_params(k_param, D, F)

    x = jax.random.normal(k_x, (B, S, D), jnp.float32).astype(jnp.bfloat16)

    # padding-style src_mask: batch 0 attends to all 8 keys, batch 1 only 6.
    # (equivalent dense mask: key_pos[None, None, :] < valid_len[:, None, None])
    valid_len = jnp.array([8, 6], jnp.int32)

    fwd = jax.jit(functools.partial(encoder_layer, n_heads=H))
    out = fwd(params, x, valid_len)
    out = jax.block_until_ready(out)

    assert out.shape == (B, S, D)
    assert bool(jnp.all(jnp.isfinite(out.astype(jnp.float32))))
    print("KERNEL_OK")
</pallas_src>

<mosaic_0001>
module attributes {stable_mosaic.version = 11 : i64} {
  func.func @_ffn_ln_kernel(%arg0: i32, %arg1: i32, %arg2: memref<1x8x32xbf16, #tpu.memory_space<vmem>>, %arg3: memref<32x64xbf16, #tpu.memory_space<vmem>>, %arg4: memref<1x64xbf16, #tpu.memory_space<vmem>>, %arg5: memref<64x32xbf16, #tpu.memory_space<vmem>>, %arg6: memref<1x32xbf16, #tpu.memory_space<vmem>>, %arg7: memref<1x32xf32, #tpu.memory_space<vmem>>, %arg8: memref<1x32xf32, #tpu.memory_space<vmem>>, %arg9: memref<1x8x32xbf16, #tpu.memory_space<vmem>>) attributes {dimension_semantics = [#tpu.dimension_semantics<parallel>, #tpu.dimension_semantics<parallel>], iteration_bounds = array<i64: 2, 1>, scalar_prefetch = 0 : i64, scratch_operands = 0 : i64, tpu.core_type = #tpu.core_type<tc>, window_params = [{transform_indices = @transform_0, window_bounds = array<i64: 1, 8, 32>}, {pipeline_mode = #tpu.pipeline_mode<synchronous>, transform_indices = @transform_1, window_bounds = array<i64: 32, 64>}, {pipeline_mode = #tpu.pipeline_mode<synchronous>, transform_indices = @transform_2, window_bounds = array<i64: 1, 64>}, {pipeline_mode = #tpu.pipeline_mode<synchronous>, transform_indices = @transform_3, window_bounds = array<i64: 64, 32>}, {pipeline_mode = #tpu.pipeline_mode<synchronous>, transform_indices = @transform_4, window_bounds = array<i64: 1, 32>}, {pipeline_mode = #tpu.pipeline_mode<synchronous>, transform_indices = @transform_5, window_bounds = array<i64: 1, 32>}, {pipeline_mode = #tpu.pipeline_mode<synchronous>, transform_indices = @transform_6, window_bounds = array<i64: 1, 32>}, {transform_indices = @transform_7, window_bounds = array<i64: 1, 8, 32>}]} {
    %c0 = arith.constant 0 : index
    %c0_0 = arith.constant 0 : index
    %c0_1 = arith.constant 0 : index
    %0 = vector.load %arg2[%c0, %c0_0, %c0_1] : memref<1x8x32xbf16, #tpu.memory_space<vmem>>, vector<1x8x32xbf16>
    %1 = vector.shape_cast %0 : vector<1x8x32xbf16> to vector<8x32xbf16>
    %c0_2 = arith.constant 0 : index
    %c0_3 = arith.constant 0 : index
    %2 = vector.load %arg3[%c0_2, %c0_3] : memref<32x64xbf16, #tpu.memory_space<vmem>>, vector<32x64xbf16>
    %cst = arith.constant dense<0.000000e+00> : vector<8x64xf32>
    %3 = tpu.matmul %1, %2, %cst {dimension_numbers = #tpu.dot_dimension_numbers<[1], [0], [0], [1], [0, 0, 1, 1], [], []>} : vector<8x32xbf16>, vector<32x64xbf16>, vector<8x64xf32> -> vector<8x64xf32>
    %c0_4 = arith.constant 0 : index
    %c0_5 = arith.constant 0 : index
    %4 = vector.load %arg4[%c0_4, %c0_5] : memref<1x64xbf16, #tpu.memory_space<vmem>>, vector<1x64xbf16>
    %5 = arith.extf %4 : vector<1x64xbf16> to vector<1x64xf32>
    %6 = vector.broadcast %5 : vector<1x64xf32> to vector<8x64xf32>
    %7 = arith.addf %3, %6 : vector<8x64xf32>
    %cst_6 = arith.constant 0.000000e+00 : f32
    %8 = vector.broadcast %cst_6 : f32 to vector<8x64xf32>
    %9 = arith.maximumf %7, %8 : vector<8x64xf32>
    %10 = arith.truncf %9 : vector<8x64xf32> to vector<8x64xbf16>
    %c0_7 = arith.constant 0 : index
    %c0_8 = arith.constant 0 : index
    %11 = vector.load %arg5[%c0_7, %c0_8] : memref<64x32xbf16, #tpu.memory_space<vmem>>, vector<64x32xbf16>
    %cst_9 = arith.constant dense<0.000000e+00> : vector<8x32xf32>
    %12 = tpu.matmul %10, %11, %cst_9 {dimension_numbers = #tpu.dot_dimension_numbers<[1], [0], [0], [1], [0, 0, 1, 1], [], []>} : vector<8x64xbf16>, vector<64x32xbf16>, vector<8x32xf32> -> vector<8x32xf32>
    %c0_10 = arith.constant 0 : index
    %c0_11 = arith.constant 0 : index
    %13 = vector.load %arg6[%c0_10, %c0_11] : memref<1x32xbf16, #tpu.memory_space<vmem>>, vector<1x32xbf16>
    %14 = arith.extf %13 : vector<1x32xbf16> to vector<1x32xf32>
    %15 = vector.broadcast %14 : vector<1x32xf32> to vector<8x32xf32>
    %16 = arith.addf %12, %15 : vector<8x32xf32>
    %17 = arith.extf %1 : vector<8x32xbf16> to vector<8x32xf32>
    %18 = arith.addf %16, %17 : vector<8x32xf32>
    %cst_12 = arith.constant dense<0.000000e+00> : vector<8xf32>
    %19 = vector.multi_reduction <add>, %18, %cst_12 [1] : vector<8x32xf32> to vector<8xf32>
    %20 = vector.shape_cast %19 : vector<8xf32> to vector<8x1xf32>
    %cst_13 = arith.constant 3.200000e+01 : f32
    %21 = vector.broadcast %cst_13 : f32 to vector<8x1xf32>
    %22 = arith.divf %20, %21 : vector<8x1xf32>
    %23 = vector.broadcast %22 : vector<8x1xf32> to vector<8x32xf32>
    %24 = arith.subf %18, %23 : vector<8x32xf32>
    %25 = arith.mulf %24, %24 : vector<8x32xf32>
    %cst_14 = arith.constant dense<0.000000e+00> : vector<8xf32>
    %26 = vector.multi_reduction <add>, %25, %cst_14 [1] : vector<8x32xf32> to vector<8xf32>
    %27 = vector.shape_cast %26 : vector<8xf32> to vector<8x1xf32>
    %cst_15 = arith.constant 3.200000e+01 : f32
    %28 = vector.broadcast %cst_15 : f32 to vector<8x1xf32>
    %29 = arith.divf %27, %28 : vector<8x1xf32>
    %30 = vector.broadcast %22 : vector<8x1xf32> to vector<8x32xf32>
    %31 = arith.subf %18, %30 : vector<8x32xf32>
    %cst_16 = arith.constant 9.99999996E-13 : f32
    %32 = vector.broadcast %cst_16 : f32 to vector<8x1xf32>
    %33 = arith.addf %29, %32 : vector<8x1xf32>
    %34 = math.rsqrt %33 : vector<8x1xf32>
    %35 = vector.broadcast %34 : vector<8x1xf32> to vector<8x32xf32>
    %36 = arith.mulf %31, %35 : vector<8x32xf32>
    %c0_17 = arith.constant 0 : index
    %c0_18 = arith.constant 0 : index
    %37 = vector.load %arg7[%c0_17, %c0_18] : memref<1x32xf32, #tpu.memory_space<vmem>>, vector<1x32xf32>
    %38 = vector.broadcast %37 : vector<1x32xf32> to vector<8x32xf32>
    %39 = arith.mulf %36, %38 : vector<8x32xf32>
    %c0_19 = arith.constant 0 : index
    %c0_20 = arith.constant 0 : index
    %40 = vector.load %arg8[%c0_19, %c0_20] : memref<1x32xf32, #tpu.memory_space<vmem>>, vector<1x32xf32>
    %41 = vector.broadcast %40 : vector<1x32xf32> to vector<8x32xf32>
    %42 = arith.addf %39, %41 : vector<8x32xf32>
    %43 = arith.truncf %42 : vector<8x32xf32> to vector<8x32xbf16>
    %c0_21 = arith.constant 0 : index
    %c0_22 = arith.constant 0 : index
    %c0_23 = arith.constant 0 : index
    %44 = vector.load %arg9[%c0_21, %c0_22, %c0_23] : memref<1x8x32xbf16, #tpu.memory_space<vmem>>, vector<1x8x32xbf16>
    %45 = vector.shape_cast %44 : vector<1x8x32xbf16> to vector<8x32xbf16>
    %46 = vector.shape_cast %43 : vector<8x32xbf16> to vector<1x8x32xbf16>
    tpu.vector_store %arg9[%c0_21, %c0_22, %c0_23], %46 {strides = array<i32>} : memref<1x8x32xbf16, #tpu.memory_space<vmem>>, vector<1x8x32xbf16>,
    return
  }
  func.func @transform_0(%arg0: i32, %arg1: i32) -> (i32, i32, i32) {
    %c0_i32 = arith.constant 0 : i32
    %c0_i32_0 = arith.constant 0 : i32
    return %arg0, %arg1, %c0_i32 : i32, i32, i32
  }
  func.func @transform_1(%arg0: i32, %arg1: i32) -> (i32, i32) {
    %c0_i32 = arith.constant 0 : i32
    %c0_i32_0 = arith.constant 0 : i32
    %c0_i32_1 = arith.constant 0 : i32
    return %c0_i32, %c0_i32_0 : i32, i32
  }
  func.func @transform_2(%arg0: i32, %arg1: i32) -> (i32, i32) {
    %c0_i32 = arith.constant 0 : i32
    %c0_i32_0 = arith.constant 0 : i32
    %c0_i32_1 = arith.constant 0 : i32
    return %c0_i32, %c0_i32_0 : i32, i32
  }
  func.func @transform_3(%arg0: i32, %arg1: i32) -> (i32, i32) {
    %c0_i32 = arith.constant 0 : i32
    %c0_i32_0 = arith.constant 0 : i32
    %c0_i32_1 = arith.constant 0 : i32
    return %c0_i32, %c0_i32_0 : i32, i32
  }
  func.func @transform_4(%arg0: i32, %arg1: i32) -> (i32, i32) {
    %c0_i32 = arith.constant 0 : i32
    %c0_i32_0 = arith.constant 0 : i32
    %c0_i32_1 = arith.constant 0 : i32
    return %c0_i32, %c0_i32_0 : i32, i32
  }
  func.func @transform_5(%arg0: i32, %arg1: i32) -> (i32, i32) {
    %c0_i32 = arith.constant 0 : i32
    %c0_i32_0 = arith.constant 0 : i32
    %c0_i32_1 = arith.constant 0 : i32
    return %c0_i32, %c0_i32_0 : i32, i32
  }
  func.func @transform_6(%arg0: i32, %arg1: i32) -> (i32, i32) {
    %c0_i32 = arith.constant 0 : i32
    %c0_i32_0 = arith.constant 0 : i32
    %c0_i32_1 = arith.constant 0 : i32
    return %c0_i32, %c0_i32_0 : i32, i32
  }
  func.func @transform_7(%arg0: i32, %arg1: i32) -> (i32, i32, i32) {
    %c0_i32 = arith.constant 0 : i32
    %c0_i32_0 = arith.constant 0 : i32
    return %arg0, %arg1, %c0_i32 : i32, i32, i32
  }
}

module attributes {stable_mosaic.version = 11 : i64} {
  func.func @_attn_ln_kernel(%arg0: i32, %arg1: i32, %arg2: memref<2xi32, #tpu.memory_space<smem>>, %arg3: memref<1x8x32xbf16, #tpu.memory_space<vmem>>, %arg4: memref<4x32x8xbf16, #tpu.memory_space<vmem>>, %arg5: memref<4x1x8xbf16, #tpu.memory_space<vmem>>, %arg6: memref<4x32x8xbf16, #tpu.memory_space<vmem>>, %arg7: memref<4x1x8xbf16, #tpu.memory_space<vmem>>, %arg8: memref<4x32x8xbf16, #tpu.memory_space<vmem>>, %arg9: memref<4x1x8xbf16, #tpu.memory_space<vmem>>, %arg10: memref<4x8x32xbf16, #tpu.memory_space<vmem>>, %arg11: memref<1x32xbf16, #tpu.memory_space<vmem>>, %arg12: memref<1x32xf32, #tpu.memory_space<vmem>>, %arg13: memref<1x32xf32, #tpu.memory_space<vmem>>, %arg14: memref<1x8x32xbf16, #tpu.memory_space<vmem>>) attributes {dimension_semantics = [#tpu.dimension_semantics<parallel>, #tpu.dimension_semantics<parallel>], iteration_bounds = array<i64: 2, 1>, scalar_prefetch = 1 : i64, scratch_operands = 0 : i64, tpu.core_type = #tpu.core_type<tc>, window_params = [{transform_indices = @transform_0, window_bounds = array<i64: 1, 8, 32>}, {pipeline_mode = #tpu.pipeline_mode<synchronous>, transform_indices = @transform_1, window_bounds = array<i64: 4, 32, 8>}, {pipeline_mode = #tpu.pipeline_mode<synchronous>, transform_indices = @transform_2, window_bounds = array<i64: 4, 1, 8>}, {pipeline_mode = #tpu.pipeline_mode<synchronous>, transform_indices = @transform_3, window_bounds = array<i64: 4, 32, 8>}, {pipeline_mode = #tpu.pipeline_mode<synchronous>, transform_indices = @transform_4, window_bounds = array<i64: 4, 1, 8>}, {pipeline_mode = #tpu.pipeline_mode<synchronous>, transform_indices = @transform_5, window_bounds = array<i64: 4, 32, 8>}, {pipeline_mode = #tpu.pipeline_mode<synchronous>, transform_indices = @transform_6, window_bounds = array<i64: 4, 1, 8>}, {pipeline_mode = #tpu.pipeline_mode<synchronous>, transform_indices = @transform_7, window_bounds = array<i64: 4, 8, 32>}, {pipeline_mode = #tpu.pipeline_mode<synchronous>, transform_indices = @transform_8, window_bounds = array<i64: 1, 32>}, {pipeline_mode = #tpu.pipeline_mode<synchronous>, transform_indices = @transform_9, window_bounds = array<i64: 1, 32>}, {pipeline_mode = #tpu.pipeline_mode<synchronous>, transform_indices = @transform_10, window_bounds = array<i64: 1, 32>}, {transform_indices = @transform_11, window_bounds = array<i64: 1, 8, 32>}]} {
    %c8_i32 = arith.constant 8 : i32
    %0 = arith.muli %arg1, %c8_i32 : i32
    %1 = tpu.assume_multiple %0, 8 : i32
    %2 = arith.index_cast %arg0 : i32 to index
    %3 = memref.load %arg2[%2] : memref<2xi32, #tpu.memory_space<smem>>
    %c0 = arith.constant 0 : index
    %c0_0 = arith.constant 0 : index
    %c0_1 = arith.constant 0 : index
    %4 = vector.load %arg3[%c0, %c0_0, %c0_1] : memref<1x8x32xbf16, #tpu.memory_space<vmem>>, vector<1x8x32xbf16>
    %5 = vector.shape_cast %4 : vector<1x8x32xbf16> to vector<8x32xbf16>
    %c0_2 = arith.constant 0 : index
    %6 = arith.index_cast %1 : i32 to index
    %c0_3 = arith.constant 0 : index
    %7 = vector.load %arg3[%c0_2, %6, %c0_3] : memref<1x8x32xbf16, #tpu.memory_space<vmem>>, vector<1x8x32xbf16>
    %8 = vector.shape_cast %7 : vector<1x8x32xbf16> to vector<8x32xbf16>
    %9 = vector.shape_cast %8 : vector<8x32xbf16> to vector<1x8x32xbf16>
    %10 = vector.broadcast %9 : vector<1x8x32xbf16> to vector<4x8x32xbf16>
    %11 = vector.shape_cast %5 : vector<8x32xbf16> to vector<1x8x32xbf16>
    %12 = vector.broadcast %11 : vector<1x8x32xbf16> to vector<4x8x32xbf16>
    %c0_4 = arith.constant 0 : index
    %c0_5 = arith.constant 0 : index
    %c0_6 = arith.constant 0 : index
    %13 = vector.load %arg4[%c0_4, %c0_5, %c0_6] : memref<4x32x8xbf16, #tpu.memory_space<vmem>>, vector<4x32x8xbf16>
    "tpu.trace_start"() <{level = 10 : i32, message = "hqd,hde->hqe"}> : () -> ()
    %cst = arith.constant dense<0.000000e+00> : vector<4x8x8xf32>
    %14 = tpu.matmul %10, %13, %cst {dimension_numbers = #tpu.dot_dimension_numbers<[2], [1], [1], [2], [0, 0, 0, 1, 1, 2], [0], [0]>} : vector<4x8x32xbf16>, vector<4x32x8xbf16>, vector<4x8x8xf32> -> vector<4x8x8xf32>
    "tpu.trace_stop"() : () -> ()
    %c0_7 = arith.constant 0 : index
    %c0_8 = arith.constant 0 : index
    %c0_9 = arith.constant 0 : index
    %15 = vector.load %arg5[%c0_7, %c0_8, %c0_9] : memref<4x1x8xbf16, #tpu.memory_space<vmem>>, vector<4x1x8xbf16>
    %16 = arith.extf %15 : vector<4x1x8xbf16> to vector<4x1x8xf32>
    %17 = vector.broadcast %16 : vector<4x1x8xf32> to vector<4x8x8xf32>
    %18 = arith.addf %14, %17 : vector<4x8x8xf32>
    %c0_10 = arith.constant 0 : index
    %c0_11 = arith.constant 0 : index
    %c0_12 = arith.constant 0 : index
    %19 = vector.load %arg6[%c0_10, %c0_11, %c0_12] : memref<4x32x8xbf16, #tpu.memory_space<vmem>>, vector<4x32x8xbf16>
    "tpu.trace_start"() <{level = 10 : i32, message = "hkd,hde->hke"}> : () -> ()
    %cst_13 = arith.constant dense<0.000000e+00> : vector<4x8x8xf32>
    %20 = tpu.matmul %12, %19, %cst_13 {dimension_numbers = #tpu.dot_dimension_numbers<[2], [1], [1], [2], [0, 0, 0, 1, 1, 2], [0], [0]>} : vector<4x8x32xbf16>, vector<4x32x8xbf16>, vector<4x8x8xf32> -> vector<4x8x8xf32>
    "tpu.trace_stop"() : () -> ()
    %c0_14 = arith.constant 0 : index
    %c0_15 = arith.constant 0 : index
    %c0_16 = arith.constant 0 : index
    %21 = vector.load %arg7[%c0_14, %c0_15, %c0_16] : memref<4x1x8xbf16, #tpu.memory_space<vmem>>, vector<4x1x8xbf16>
    %22 = arith.extf %21 : vector<4x1x8xbf16> to vector<4x1x8xf32>
    %23 = vector.broadcast %22 : vector<4x1x8xf32> to vector<4x8x8xf32>
    %24 = arith.addf %20, %23 : vector<4x8x8xf32>
    %c0_17 = arith.constant 0 : index
    %c0_18 = arith.constant 0 : index
    %c0_19 = arith.constant 0 : index
    %25 = vector.load %arg8[%c0_17, %c0_18, %c0_19] : memref<4x32x8xbf16, #tpu.memory_space<vmem>>, vector<4x32x8xbf16>
    "tpu.trace_start"() <{level = 10 : i32, message = "hkd,hde->hke"}> : () -> ()
    %cst_20 = arith.constant dense<0.000000e+00> : vector<4x8x8xf32>
    %26 = tpu.matmul %12, %25, %cst_20 {dimension_numbers = #tpu.dot_dimension_numbers<[2], [1], [1], [2], [0, 0, 0, 1, 1, 2], [0], [0]>} : vector<4x8x32xbf16>, vector<4x32x8xbf16>, vector<4x8x8xf32> -> vector<4x8x8xf32>
    "tpu.trace_stop"() : () -> ()
    %c0_21 = arith.constant 0 : index
    %c0_22 = arith.constant 0 : index
    %c0_23 = arith.constant 0 : index
    %27 = vector.load %arg9[%c0_21, %c0_22, %c0_23] : memref<4x1x8xbf16, #tpu.memory_space<vmem>>, vector<4x1x8xbf16>
    %28 = arith.extf %27 : vector<4x1x8xbf16> to vector<4x1x8xf32>
    %29 = vector.broadcast %28 : vector<4x1x8xf32> to vector<4x8x8xf32>
    %30 = arith.addf %26, %29 : vector<4x8x8xf32>
    %31 = arith.truncf %18 : vector<4x8x8xf32> to vector<4x8x8xbf16>
    %32 = arith.truncf %24 : vector<4x8x8xf32> to vector<4x8x8xbf16>
    "tpu.trace_start"() <{level = 10 : i32, message = "hqe,hke->hqk"}> : () -> ()
    %cst_24 = arith.constant dense<0.000000e+00> : vector<4x8x8xf32>
    %33 = tpu.matmul %31, %32, %cst_24 {dimension_numbers = #tpu.dot_dimension_numbers<[2], [2], [1], [1], [0, 0, 0, 1, 1, 1], [0], [0]>} : vector<4x8x8xbf16>, vector<4x8x8xbf16>, vector<4x8x8xf32> -> vector<4x8x8xf32>
    "tpu.trace_stop"() : () -> ()
    %cst_25 = arith.constant 0.353553385 : f32
    %34 = vector.broadcast %cst_25 : f32 to vector<4x8x8xf32>
    %35 = arith.mulf %33, %34 : vector<4x8x8xf32>
    %36 = tpu.iota {dimensions = array<i32: 2>} : vector<4x8x8xi32>
    %37 = vector.broadcast %3 : i32 to vector<4x8x8xi32>
    %38 = arith.cmpi slt, %36, %37 : vector<4x8x8xi32>
    %cst_26 = arith.constant -1.000000e+04 : f32
    %39 = vector.broadcast %cst_26 : f32 to vector<4x8x8xf32>
    %40 = arith.select %38, %35, %39 : vector<4x8x8xi1>, vector<4x8x8xf32>
    %cst_27 = arith.constant dense<0xFF800000> : vector<4x8xf32>
    %41 = vector.multi_reduction <maximumf>, %40, %cst_27 [2] : vector<4x8x8xf32> to vector<4x8xf32>
    %42 = vector.shape_cast %41 : vector<4x8xf32> to vector<4x8x1xf32>
    %43 = vector.broadcast %42 : vector<4x8x1xf32> to vector<4x8x8xf32>
    %44 = arith.subf %40, %43 : vector<4x8x8xf32>
    %45 = math.exp %44 : vector<4x8x8xf32>
    %cst_28 = arith.constant dense<0.000000e+00> : vector<4x8xf32>
    %46 = vector.multi_reduction <add>, %45, %cst_28 [2] : vector<4x8x8xf32> to vector<4x8xf32>
    %47 = vector.shape_cast %46 : vector<4x8xf32> to vector<4x8x1xf32>
    %48 = tpu.reciprocal %47 {approx = true} : vector<4x8x1xf32> -> vector<4x8x1xf32>
    %49 = vector.broadcast %48 : vector<4x8x1xf32> to vector<4x8x8xf32>
    %50 = arith.mulf %45, %49 : vector<4x8x8xf32>
    %51 = arith.truncf %50 : vector<4x8x8xf32> to vector<4x8x8xbf16>
    %52 = arith.truncf %30 : vector<4x8x8xf32> to vector<4x8x8xbf16>
    "tpu.trace_start"() <{level = 10 : i32, message = "hqk,hke->hqe"}> : () -> ()
    %cst_29 = arith.constant dense<0.000000e+00> : vector<4x8x8xf32>
    %53 = tpu.matmul %51, %52, %cst_29 {dimension_numbers = #tpu.dot_dimension_numbers<[2], [1], [1], [2], [0, 0, 0, 1, 1, 2], [0], [0]>} : vector<4x8x8xbf16>, vector<4x8x8xbf16>, vector<4x8x8xf32> -> vector<4x8x8xf32>
    "tpu.trace_stop"() : () -> ()
    %54 = arith.truncf %53 : vector<4x8x8xf32> to vector<4x8x8xbf16>
    %c0_30 = arith.constant 0 : index
    %c0_31 = arith.constant 0 : index
    %c0_32 = arith.constant 0 : index
    %55 = vector.load %arg10[%c0_30, %c0_31, %c0_32] : memref<4x8x32xbf16, #tpu.memory_space<vmem>>, vector<4x8x32xbf16>
    "tpu.trace_start"() <{level = 10 : i32, message = "hqe,hed->hqd"}> : () -> ()
    %cst_33 = arith.constant dense<0.000000e+00> : vector<4x8x32xf32>
    %56 = tpu.matmul %54, %55, %cst_33 {dimension_numbers = #tpu.dot_dimension_numbers<[2], [1], [1], [2], [0, 0, 0, 1, 1, 2], [0], [0]>} : vector<4x8x8xbf16>, vector<4x8x32xbf16>, vector<4x8x32xf32> -> vector<4x8x32xf32>
    "tpu.trace_stop"() : () -> ()
    %cst_34 = arith.constant dense<0.000000e+00> : vector<8x32xf32>
    %57 = vector.multi_reduction <add>, %56, %cst_34 [0] : vector<4x8x32xf32> to vector<8x32xf32>
    %c0_35 = arith.constant 0 : index
    %c0_36 = arith.constant 0 : index
    %58 = vector.load %arg11[%c0_35, %c0_36] : memref<1x32xbf16, #tpu.memory_space<vmem>>, vector<1x32xbf16>
    %59 = arith.extf %58 : vector<1x32xbf16> to vector<1x32xf32>
    %60 = vector.broadcast %59 : vector<1x32xf32> to vector<8x32xf32>
    %61 = arith.addf %57, %60 : vector<8x32xf32>
    %62 = arith.extf %8 : vector<8x32xbf16> to vector<8x32xf32>
    %63 = arith.addf %61, %62 : vector<8x32xf32>
    %cst_37 = arith.constant dense<0.000000e+00> : vector<8xf32>
    %64 = vector.multi_reduction <add>, %63, %cst_37 [1] : vector<8x32xf32> to vector<8xf32>
    %65 = vector.shape_cast %64 : vector<8xf32> to vector<8x1xf32>
    %cst_38 = arith.constant 3.200000e+01 : f32
    %66 = vector.broadcast %cst_38 : f32 to vector<8x1xf32>
    %67 = arith.divf %65, %66 : vector<8x1xf32>
    %68 = vector.broadcast %67 : vector<8x1xf32> to vector<8x32xf32>
    %69 = arith.subf %63, %68 : vector<8x32xf32>
    %70 = arith.mulf %69, %69 : vector<8x32xf32>
    %cst_39 = arith.constant dense<0.000000e+00> : vector<8xf32>
    %71 = vector.multi_reduction <add>, %70, %cst_39 [1] : vector<8x32xf32> to vector<8xf32>
    %72 = vector.shape_cast %71 : vector<8xf32> to vector<8x1xf32>
    %cst_40 = arith.constant 3.200000e+01 : f32
    %73 = vector.broadcast %cst_40 : f32 to vector<8x1xf32>
    %74 = arith.divf %72, %73 : vector<8x1xf32>
    %75 = vector.broadcast %67 : vector<8x1xf32> to vector<8x32xf32>
    %76 = arith.subf %63, %75 : vector<8x32xf32>
    %cst_41 = arith.constant 9.99999996E-13 : f32
    %77 = vector.broadcast %cst_41 : f32 to vector<8x1xf32>
    %78 = arith.addf %74, %77 : vector<8x1xf32>
    %79 = math.rsqrt %78 : vector<8x1xf32>
    %80 = vector.broadcast %79 : vector<8x1xf32> to vector<8x32xf32>
    %81 = arith.mulf %76, %80 : vector<8x32xf32>
    %c0_42 = arith.constant 0 : index
    %c0_43 = arith.constant 0 : index
    %82 = vector.load %arg12[%c0_42, %c0_43] : memref<1x32xf32, #tpu.memory_space<vmem>>, vector<1x32xf32>
    %83 = vector.broadcast %82 : vector<1x32xf32> to vector<8x32xf32>
    %84 = arith.mulf %81, %83 : vector<8x32xf32>
    %c0_44 = arith.constant 0 : index
    %c0_45 = arith.constant 0 : index
    %85 = vector.load %arg13[%c0_44, %c0_45] : memref<1x32xf32, #tpu.memory_space<vmem>>, vector<1x32xf32>
    %86 = vector.broadcast %85 : vector<1x32xf32> to vector<8x32xf32>
    %87 = arith.addf %84, %86 : vector<8x32xf32>
    %88 = arith.truncf %87 : vector<8x32xf32> to vector<8x32xbf16>
    %c0_46 = arith.constant 0 : index
    %c0_47 = arith.constant 0 : index
    %c0_48 = arith.constant 0 : index
    %89 = vector.load %arg14[%c0_46, %c0_47, %c0_48] : memref<1x8x32xbf16, #tpu.memory_space<vmem>>, vector<1x8x32xbf16>
    %90 = vector.shape_cast %89 : vector<1x8x32xbf16> to vector<8x32xbf16>
    %91 = vector.shape_cast %88 : vector<8x32xbf16> to vector<1x8x32xbf16>
    tpu.vector_store %arg14[%c0_46, %c0_47, %c0_48], %91 {strides = array<i32>} : memref<1x8x32xbf16, #tpu.memory_space<vmem>>, vector<1x8x32xbf16>,
    return
  }
  func.func @transform_0(%arg0: i32, %arg1: i32, %arg2: memref<2xi32, #tpu.memory_space<smem>>) -> (i32, i32, i32) {
    %c0_i32 = arith.constant 0 : i32
    %c0_i32_0 = arith.constant 0 : i32
    %c0_i32_1 = arith.constant 0 : i32
    return %arg0, %c0_i32, %c0_i32_0 : i32, i32, i32
  }
  func.func @transform_1(%arg0: i32, %arg1: i32, %arg2: memref<2xi32, #tpu.memory_space<smem>>) -> (i32, i32, i32) {
    %c0_i32 = arith.constant 0 : i32
    %c0_i32_0 = arith.constant 0 : i32
    %c0_i32_1 = arith.constant 0 : i32
    %c0_i32_2 = arith.constant 0 : i32
    return %c0_i32, %c0_i32_0, %c0_i32_1 : i32, i32, i32
  }
  func.func @transform_2(%arg0: i32, %arg1: i32, %arg2: memref<2xi32, #tpu.memory_space<smem>>) -> (i32, i32, i32) {
    %c0_i32 = arith.constant 0 : i32
    %c0_i32_0 = arith.constant 0 : i32
    %c0_i32_1 = arith.constant 0 : i32
    %c0_i32_2 = arith.constant 0 : i32
    return %c0_i32, %c0_i32_0, %c0_i32_1 : i32, i32, i32
  }
  func.func @transform_3(%arg0: i32, %arg1: i32, %arg2: memref<2xi32, #tpu.memory_space<smem>>) -> (i32, i32, i32) {
    %c0_i32 = arith.constant 0 : i32
    %c0_i32_0 = arith.constant 0 : i32
    %c0_i32_1 = arith.constant 0 : i32
    %c0_i32_2 = arith.constant 0 : i32
    return %c0_i32, %c0_i32_0, %c0_i32_1 : i32, i32, i32
  }
  func.func @transform_4(%arg0: i32, %arg1: i32, %arg2: memref<2xi32, #tpu.memory_space<smem>>) -> (i32, i32, i32) {
    %c0_i32 = arith.constant 0 : i32
    %c0_i32_0 = arith.constant 0 : i32
    %c0_i32_1 = arith.constant 0 : i32
    %c0_i32_2 = arith.constant 0 : i32
    return %c0_i32, %c0_i32_0, %c0_i32_1 : i32, i32, i32
  }
  func.func @transform_5(%arg0: i32, %arg1: i32, %arg2: memref<2xi32, #tpu.memory_space<smem>>) -> (i32, i32, i32) {
    %c0_i32 = arith.constant 0 : i32
    %c0_i32_0 = arith.constant 0 : i32
    %c0_i32_1 = arith.constant 0 : i32
    %c0_i32_2 = arith.constant 0 : i32
    return %c0_i32, %c0_i32_0, %c0_i32_1 : i32, i32, i32
  }
  func.func @transform_6(%arg0: i32, %arg1: i32, %arg2: memref<2xi32, #tpu.memory_space<smem>>) -> (i32, i32, i32) {
    %c0_i32 = arith.constant 0 : i32
    %c0_i32_0 = arith.constant 0 : i32
    %c0_i32_1 = arith.constant 0 : i32
    %c0_i32_2 = arith.constant 0 : i32
    return %c0_i32, %c0_i32_0, %c0_i32_1 : i32, i32, i32
  }
  func.func @transform_7(%arg0: i32, %arg1: i32, %arg2: memref<2xi32, #tpu.memory_space<smem>>) -> (i32, i32, i32) {
    %c0_i32 = arith.constant 0 : i32
    %c0_i32_0 = arith.constant 0 : i32
    %c0_i32_1 = arith.constant 0 : i32
    %c0_i32_2 = arith.constant 0 : i32
    return %c0_i32, %c0_i32_0, %c0_i32_1 : i32, i32, i32
  }
  func.func @transform_8(%arg0: i32, %arg1: i32, %arg2: memref<2xi32, #tpu.memory_space<smem>>) -> (i32, i32) {
    %c0_i32 = arith.constant 0 : i32
    %c0_i32_0 = arith.constant 0 : i32
    %c0_i32_1 = arith.constant 0 : i32
    return %c0_i32, %c0_i32_0 : i32, i32
  }
  func.func @transform_9(%arg0: i32, %arg1: i32, %arg2: memref<2xi32, #tpu.memory_space<smem>>) -> (i32, i32) {
    %c0_i32 = arith.constant 0 : i32
    %c0_i32_0 = arith.constant 0 : i32
    %c0_i32_1 = arith.constant 0 : i32
    return %c0_i32, %c0_i32_0 : i32, i32
  }
  func.func @transform_10(%arg0: i32, %arg1: i32, %arg2: memref<2xi32, #tpu.memory_space<smem>>) -> (i32, i32) {
    %c0_i32 = arith.constant 0 : i32
    %c0_i32_0 = arith.constant 0 : i32
    %c0_i32_1 = arith.constant 0 : i32
    return %c0_i32, %c0_i32_0 : i32, i32
  }
  func.func @transform_11(%arg0: i32, %arg1: i32, %arg2: memref<2xi32, #tpu.memory_space<smem>>) -> (i32, i32, i32) {
    %c0_i32 = arith.constant 0 : i32
    %c0_i32_0 = arith.constant 0 : i32
    return %arg0, %arg1, %c0_i32 : i32, i32, i32
  }
}

</mosaic_0001>

<bundles_post_ra>
// kernel: encoder_layer.3
= control target key start
LH: loop header
LB: loop body
LE: loop exit
PB: predicated region body
PF: predicated region fallthrough
CT: control target
= control target key end

     0   :  { %12 = vsyncpa [#allocation3], 0  ;;  %s939_s0 = inlined_call_operand.vmem [shape: bf16[2,8,32], index: 0, kind: input, shape index: {}]   ;;  %s940_s1 = inlined_call_operand.vmem [shape: bf16[32,64], index: 1, kind: input, shape index: {}]   ;;  %s941_s2 = inlined_call_operand.vmem [shape: bf16[1,64], index: 2, kind: input, shape index: {}]   ;;  %s942_s3 = inlined_call_operand.vmem [shape: bf16[64,32], index: 3, kind: input, shape index: {}]   ;;  %s943_s4 = inlined_call_operand.vmem [shape: bf16[1,32], index: 4, kind: input, shape index: {}]   ;;  %s944_s5 = inlined_call_operand.vmem [shape: f32[1,32], index: 5, kind: input, shape index: {}]   ;;  %s945_s6 = inlined_call_operand.vmem [shape: f32[1,32], index: 6, kind: input, shape index: {}]   ;;  %s946_s7 = inlined_call_operand.hbm [shape: bf16[2,8,32], index: 7, kind: output, shape index: {}]  }
   0x1   :  { %14 = vsyncpa [#allocation3 + $0x1], 0  ;;  %s807_s24 = smov 0   ;;  %s809_s25 = smov 0  }
   0x2   :  { %s811_s26 = smov 0   ;;  %s813_s27 = smov 0  }
   0x3   :  { %s815_s28 = smov 0   ;;  %s817_s29 = smov 0  }
   0x4 LB: > { %s572_s30 = sadd.s32 4294967295, %s762_s29   ;;  %s573_s8 = sadd.s32 4294967294, %s762_s29   ;;  %s762_s29 = sphi %s817_s29, %s20_s29   ;;  %s758_s28 = sphi %s815_s28, %s953_s28   ;;  %s754_s27 = sphi %s813_s27, %s952_s27   ;;  %s750_s26 = sphi %s811_s26, %s951_s26   ;;  %s746_s25 = sphi %s809_s25, %s950_s25   ;;  %s742_s24 = sphi %s807_s24, %s949_s24  }
   0x5   : > { %s32_s9 = sadd.s32 1, %s758_s28  ;;  %s195_s10 = sadd.s32 1, %s750_s26 }
   0x6   : > { %p34_p0 = scmp.ge.s32.totalorder %s32_s9, 2  ;;  %p205_p1 = scmp.ne.s32.totalorder %s750_s26, %s746_s25 }
   0x7   : > { %p206_p2 = scmp.eq.s32.totalorder %s572_s30, 1  ;;  %p211_p3 = scmp.ne.s32.totalorder %s746_s25, %s742_s24 }
   0x8   : > { %s955_s9 = smov (%p34_p0, %s32_s9), 0  ;;  %p212_p5 = scmp.eq.s32.totalorder %s573_s8, 1 }
   0x9   : > { %p847_p4 = por %p206_p2, %p205_p1  ;;  %s190_s12 = ssub.s32 %s758_s28, %s955_s9 }
   0xa   : > { %p576_p6 = scmp.ge.s32.totalorder %s762_s29, 1  ;;  %p193_p7 = scmp.eq.s32.totalorder %s190_s12, 0 }
   0xb   : > { %p854_p8 = por %p212_p5, %p211_p3  ;;  %p258_p9 = scmp.lt.s32.totalorder %s762_s29, 3 }
   0xc   : > { %s860_s14 = scalar_select %p193_p7, %s750_s26, %s195_s10  }
   0xd   : > { %p259_p10 = pnand %p576_p6, %p258_p9 }
   0xe   : > { %p292_p11 = scmp.lt.s32.totalorder (!%p259_p10), %s754_s27, 1  ;;  %s289_s23 = sand.u32 (!%p259_p10), 1, %s746_s25  }
   0xf   : > { %262 = sbr.rel (%p259_p10) target bundleno = 748 (0x2ec), region = 48  ;;  %s590_s16 = sshll.u32 (!%p259_p10), %s754_s27, 6 }
  0x10   : > { %s487_s22 = scalar_lea.sflag (!%p259_p10), [#allocation3], %s289_s23  ;;  %s766_s10 = smov (!%p259_p10), [#allocation2]  }
  0x14   : > { %v678_v0 = vld [vmem:[%s940_s1 + $0x8] sm:$0xff]   ;;  %v764_v1 = vmov 0.0   ;;  %v679_v2 = vld [vmem:[%s940_s1] sm:$0xff]   ;;  %vm765_vm0 = vmmov 0   ;;  %v680_v3 = vld [vmem:[%s942_s3 + $0x18] sm:$0xff]   ;;  %s293_s21 = scalar_select %p292_p11, %s754_s27, 1  ;;  %v307_v8 = vlaneseq }
  0x15   : > { %601 = vmatprep.subr.bf16.mxu0 %v764_v1  ;;  %609 = vmatprep.subr.bf16.mxu1 %v764_v1  ;;  %v681_v4 = vld [vmem:[%s942_s3 + $0x10] sm:$0xff]   ;;  %vm323_vm1 = vcmask 261120   ;;  %v682_v6 = vld [vmem:[%s942_s3 + $0x8] sm:$0xff]   ;;  %v683_v7 = vld [vmem:[%s942_s3] sm:$0xff]   ;;  %vm407_vm2 = vcmask 523264   ;;  %vm484_vm3 = vcmask 257024  }
  0x16   : > { %602 = vmatpush3.bf16.msra.mxu0 %v678_v0  ;;  %605 = vmatprep.mubr.msk.bf16.mxu0 %vm765_vm0, %v764_v1  ;;  %s578_s30 = sshll.u32 %s293_s21, 2  ;;  %v308_v9 = vshrl.u32 %v307_v8, 7  ;;  %v305_v10 = vld [vmem:[%s941_s2] sm:$0x1]  ;;  %s499_s21 = scalar_lea.hbm %s946_s7, %s590_s16 }
  0x17   : > { %603 = vmatprep.subr.bf16.mxu0 %v764_v1  ;;  %617 = vmatprep.mubr.msk.bf16.mxu1 %vm765_vm0, %v764_v1  ;;  %s298_s12 = scalar_lea.vmem %s939_s0, %s578_s30  ;;  %v306_v11 = vunpack.c.l.bf16 %v305_v10  ;;  %v377_v21 = vld [vmem:[%s943_s4] sm:$0x1]  ;;  %s577_s30 = sshll.u32 %s289_s23, 2 }
  0x18   : > { %610 = vmatpush3.bf16.msra.mxu1 %v680_v3  ;;  %v300_v5 = vld [vmem:[%s298_s12] sm:$0xf]  ;;  %v309_v12 = vsub.s32 0, %v308_v9  ;;  %v378_v22 = vunpack.c.l.bf16 %v377_v21  ;;  %s291_s17 = scalar_lea.vmem [#allocation2], %s577_s30  ;;  %s690_s12 = sshll.u32 %s766_s10, 4  ;;  %s691_s12 = int_to_ptr.vmem [resolvable:$false] %s690_s12 }
  0x19   : > { %611 = vmatprep.subr.bf16.mxu1 %v764_v1  ;;  %v451_v24 = vunpack.c.l.bf16 %v300_v5  ;;  %v587_v41 = vld [vmem:[%s944_s5] ss:$0 sm:$0xff]  ;;  %s501_s18 = sshll.u32 %s291_s17, 4  ;;  %s692_s27 = scalar_lea.vmem %s691_s12, 128  ;;  %s502_s18 = int_to_ptr.vmem [resolvable:$true] %s501_s18 }
  0x1a   : > { %604 = vmatpush3.bf16.msra.mxu0 %v679_v2  ;;  %v310_v13 = vrot.slane %v306_v11, %v309_v12  ;;  %v382_v23 = vrot.slane %v378_v22, %v309_v12  ;;  %v588_v43 = vld [vmem:[%s945_s6] ss:$0 sm:$0xff]  ;;  %s686_s8 = scalar_lea.vmem %s502_s18, 64  ;;  %p693_p1 = scmp.lt.s32.totalorder %s502_s18, %s691_s12 }
  0x1b   : > { %p687_p12 = scmp.ne.s32.totalorder %s502_s18, %s686_s8  ;;  %p694_p2 = scmp.lt.s32.totalorder %s692_s27, %s686_s8 }
  0x1c   : > { %612 = vmatpush3.bf16.msra.mxu1 %v681_v4 }
  0x1d   : > { %606 = vmatmul.mubr.msk.bf16.vlgmr.msra.gmra.mxu0 %vm323_vm1, %v300_v5  ;;  %613 = vmatprep.subr.bf16.mxu1 %v764_v1  ;;  %p688_p13 = pnand %p687_p12, %p847_p4  ;;  %p695_p3 = por %p694_p2, %p693_p1 }
  0x1f   : > { %p689_p0 = pneg %p688_p13 }
  0x20   : > { %614 = vmatpush3.bf16.msra.mxu1 %v682_v6 }
  0x21   : > { %615 = vmatprep.subr.bf16.mxu1 %v764_v1  ;;  %p696_p5 = pnand %p695_p3, %p689_p0 }
  0x24   : > { %616 = vmatpush3.bf16.msra.mxu1 %v683_v7 }
  0xdd   : > { %v361_v14 = vpop.f32.mrf.mxu0 }
  0xde   : > { %v362_v15 = vadd.f32 %v361_v14, %v310_v13 }
  0xdf   : > { %v607_v16 = vpop.f32.mrf.mxu0 }
  0xe0   : > { %v367_v17 = vmax.f32 %v362_v15, 0.0 }
  0xe1   : > { %v364_v18 = vpop.f32.mrf.mxu0 }
  0xe2   : > { %v368_v19 = vpack.c.bf16 %v367_v17, %v367_v17 }
  0xe3   : > { %v608_v20 = vpop.f32.mrf.mxu0 }
  0xe4   : > { %618 = vmatmul.mubr.msk.bf16.vlgmr.msra.gmra.mxu1 %vm407_vm2, %v368_v19 }
 0x1a4   : > { %v445_v25 = vpop.f32.mrf.mxu1 }
 0x1a5   : > { %v446_v26 = vadd.f32 %v445_v25, %v382_v23 }
 0x1a6   : > { %v619_v27 = vpop.f32.mrf.mxu1 }
 0x1a7   : > { %v452_v28 = vadd.f32 %v451_v24, %v446_v26 }
 0x1a8   : > { %v448_v29 = vpop.f32.mrf.mxu1 }
 0x1a9   : > { %v453_v30 = vsel %vm323_vm1, %v452_v28, 0.0 }
 0x1aa   : > { %454 = vadd.xlane.f32.xlu0 %v453_v30  ;;  %v620_v31 = vpop.f32.mrf.mxu1 }
 0x233   : > { %v455_v32 = vpop.xlane.xlu0 %454 }
 0x234   : > { %v457_v33 = vmul.f32 0.03125, %v455_v32 }
 0x236   : > { %v458_v34 = vsub.f32 %v452_v28, %v457_v33 }
 0x238   : > { %v459_v35 = vmul.f32 %v458_v34, %v458_v34 }
 0x23a   : > { %v460_v36 = vsel %vm323_vm1, %v459_v35, 0.0 }
 0x23b   : > { %461 = vadd.xlane.f32.xlu0 %v460_v36 }
 0x2c4   : > { %v462_v37 = vpop.xlane.xlu0 %461 }
 0x2c5   : > { %v463_v38 = vmul.f32 0.03125, %v462_v37 }
 0x2c7   : > { %v464_v39 = vadd.f32 1e-12, %v463_v38 }
 0x2c9   : > { %684 = vrsqrt.f32 %v464_v39 }
 0x2d6   : > { %v685_v40 = vpop.eup %684 }
 0x2d7   : > { %v466_v42 = vmul.f32 %v685_v40, %v458_v34 }
 0x2d9   : > { %v474_v44 = vmul.f32 %v587_v41, %v466_v42 }
 0x2db   : > { %v482_v45 = vadd.f32 %v588_v43, %v474_v44 }
 0x2dd   : > { %v483_v46 = vpack.c.bf16 %v482_v45, %v482_v45 }
 0x2df   : > { %485 = vst.msk [vmem:[%s291_s17] sm:$0xf] %vm484_vm3, %v483_v46 }
 0x2e0   : > { %699 = shalt.err (!%p696_p5)
}
 0x2e1   : > { %s700_s30 = scalar_lea.hbm %s499_s21, 64  ;;  %s704_s16 = scalar_lea.hbm %s946_s7, 128 }
 0x2e2   : > { %p701_p6 = scmp.ne.s32.totalorder %s499_s21, %s700_s30  ;;  %p705_p10 = scmp.lt.s32.totalorder %s499_s21, %s946_s7 }
 0x2e3   : > { %p706_p11 = scmp.lt.s32.totalorder %s704_s16, %s700_s30 }
 0x2e4   : > { %p702_p7 = pnand %p701_p6, %p847_p4 }
 0x2e5   : > { %p707_p12 = por %p706_p11, %p705_p10 }
 0x2e6   : > { %p703_p9 = pneg %p702_p7 }
 0x2e8   : > { %p708_p13 = pnand %p707_p12, %p703_p9 }
 0x2ea   : > { %711 = shalt.err (!%p708_p13)
}
 0x2eb   : > { %621 = dma.vmem_to_hbm [thread:$0]  (%p847_p4), %s502_s18, 64, %s499_s21, %s487_s22  }
 0x2ec PF: > { %p627_p0 = scmp.ge.s32.totalorder %s762_s29, 2  ;;  %s513_s20 = sand.u32 1, %s742_s24  }
 0x2ed   : > { %s514_s8 = scalar_lea.sflag [#allocation3], %s513_s20 }
 0x2ee   : > { %p624_p1 = pnand %p627_p0, %p854_p8 }
 0x2f0   : > { %p625_p2 = pneg %p624_p1 }
 0x2f2   : > { %737 = dma.done.wait (%p625_p2), %s514_s8, 64  }
 0x2f3   : > { %739 = vsyncadd (%p625_p2), %s514_s8, 4294967232  ;;  %s20_s29 = sadd.s32 1, %s762_s29   ;;  %s949_s24 = smov %s746_s25 }
 0x2f4   : > { %p17_p3 = scmp.ge.s32.totalorder %s20_s29, 4   ;;  %s950_s25 = smov %s750_s26 }
 0x2f5   : > { %s951_s26 = smov %s860_s14  ;;  %s952_s27 = smov %s758_s28 }
 0x2f6   : > { %s953_s28 = smov %s955_s9  ;;  %19 = sbr.rel (!%p17_p3) target bundleno = 4 (0x4), region = 83 }
 0x2fb   :  { %519 = vsyncpa [#allocation3], 1 }
 0x2fc   :  { %521 = vsyncpa [#allocation3 + $0x1], 1 }

// kernel: encoder_layer.2
= control target key start
LH: loop header
LB: loop body
LE: loop exit
PB: predicated region body
PF: predicated region fallthrough
CT: control target
= control target key end

     0   :  { %s2750_s0 = inlined_call_operand.vmem [shape: s32[2], index: 0, kind: input, shape index: {}]   ;;  %s2751_s1 = inlined_call_operand.vmem [shape: bf16[2,8,32], index: 1, kind: input, shape index: {}]   ;;  %s2752_s2 = inlined_call_operand.vmem [shape: bf16[4,32,8], index: 2, kind: input, shape index: {}]   ;;  %s2753_s3 = inlined_call_operand.vmem [shape: bf16[4,1,8], index: 3, kind: input, shape index: {}]   ;;  %s2754_s4 = inlined_call_operand.vmem [shape: bf16[4,32,8], index: 4, kind: input, shape index: {}]   ;;  %s2755_s5 = inlined_call_operand.vmem [shape: bf16[4,1,8], index: 5, kind: input, shape index: {}]   ;;  %s2756_s6 = inlined_call_operand.vmem [shape: bf16[4,32,8], index: 6, kind: input, shape index: {}]   ;;  %s2757_s7 = inlined_call_operand.vmem [shape: bf16[4,1,8], index: 7, kind: input, shape index: {}]   ;;  %s2758_s8 = inlined_call_operand.vmem [shape: bf16[4,8,32], index: 8, kind: input, shape index: {}]   ;;  %s2759_s9 = inlined_call_operand.vmem [shape: bf16[1,32], index: 9, kind: input, shape index: {}]   ;;  %s2760_s10 = inlined_call_operand.vmem [shape: f32[1,32], index: 10, kind: input, shape index: {}]   ;;  %s2761_s11 = inlined_call_operand.vmem [shape: f32[1,32], index: 11, kind: input, shape index: {}]   ;;  %s2762_s12 = inlined_call_operand.vmem [shape: bf16[2,8,32], index: 12, kind: output, shape index: {}]  }
   0x1   :  { %s17_s23 = sshll.u32 %s2750_s0, 4  ;;  %s18_s23 = int_to_ptr.vmem [resolvable:$true] %s17_s23 }
   0x2   :  { %s2281_s24 = scalar_lea.vmem %s18_s23, 16  ;;  %p2286_p1 = scmp.lt.s32.totalorder %s18_s23, %s18_s23 }
   0x3   :  { %p2282_p0 = scmp.ne.s32.totalorder %s18_s23, %s2281_s24  ;;  %p2287_p2 = scmp.lt.s32.totalorder %s2281_s24, %s2281_s24 }
   0x5   :  { %p2288_p3 = por %p2287_p2, %p2286_p1 }
   0x7   :  { %p2289_p4 = pnand %p2288_p3, %p2282_p0 }
   0x9   :  { %2292 = shalt.err (!%p2289_p4)  }
   0xa   :  { %s2319_s25 = smov [#allocation3]  }
   0xb   :  { %20 = dma.vmem_to_smem %s18_s23, 16, %s2319_s25, [#allocation2] }
   0xc   :  { %2305 = dma.done.wait [#allocation2], 16 }
   0xd   :  { %2306 = vsyncadd [#allocation2], 4294967280 }
   0xe   :  { %22 = sfence }
   0xf   :  { %s2390_s26 = smov 0   ;;  %s2392_s27 = smov 0  }
  0x10   :  { %s2394_s28 = smov 0  }
  0x11 LB: > { %s40_s0 = sadd.s32 1, %s2313_s27  ;;  %p1929_p5 = scmp.ge.s32.totalorder %s2317_s28, 1  ;;  %s2317_s28 = sphi %s2394_s28, %s28_s28   ;;  %s2313_s27 = sphi %s2392_s27, %s2766_s27   ;;  %s2309_s26 = sphi %s2390_s26, %s2765_s26  }
  0x12   : > { %p42_p6 = scmp.ge.s32.totalorder %s40_s0, 2  ;;  %p357_p7 = scmp.lt.s32.totalorder %s2317_s28, 3 }
  0x14   : > { %s2768_s0 = smov (%p42_p6, %s40_s0), 0  ;;  %p358_p8 = pnand %p1929_p5, %p357_p7 }
  0x15   : > { %p398_p9 = scmp.lt.s32.totalorder (!%p358_p8), %s2309_s26, 1  ;;  %s411_s17 = sld [smem:[#allocation3 + %s2309_s26]] (!%p358_p8) }
  0x16   : > { %361 = sbr.rel (%p358_p8) target bundleno = 1485 (0x5cd), region = 64 }
  0x1b   : > { %v2239_v0 = vld [vmem:[%s2752_s2 + $0x8] sm:$0xff]   ;;  %v2320_v1 = vmov 0.0   ;;  %v2240_v2 = vld [vmem:[%s2752_s2 + $0x18] sm:$0xff]   ;;  %v2241_v3 = vld [vmem:[%s2752_s2] sm:$0xff]   ;;  %vm2321_vm0 = vmmov 0   ;;  %s2432_s19 = scalar_select %p398_p9, %s2309_s26, 1  ;;  %v442_v30 = vlaneseq }
  0x1c   : > { %2044 = vmatprep.subr.bf16.mxu0 %v2320_v1  ;;  %2052 = vmatprep.subr.bf16.mxu1 %v2320_v1  ;;  %v2242_v4 = vld [vmem:[%s2752_s2 + $0x10] sm:$0xff]   ;;  %vm470_vm1 = vcmask 261120   ;;  %v2243_v5 = vld [vmem:[%s2752_s2 + $0x28] sm:$0xff]   ;;  %v2244_v6 = vld [vmem:[%s2752_s2 + $0x38] sm:$0xff]   ;;  %vm1177_vm2 = vcmask 64512   ;;  %vm1429_vm3 = vcmask 1043456  }
  0x1d   : > { %2045 = vmatpush3.bf16.msra.mxu0 %v2239_v0  ;;  %2048 = vmatprep.mubr.msk.bf16.mxu0 %vm2321_vm0, %v2320_v1  ;;  %s1930_s20 = sshll.u32 %s2432_s19, 2  ;;  %v2245_v8 = vld [vmem:[%s2752_s2 + $0x20] sm:$0xff]   ;;  %v2246_v9 = vld [vmem:[%s2752_s2 + $0x30] sm:$0xff]   ;;  %v2247_v10 = vld [vmem:[%s2754_s4 + $0x8] sm:$0xff]   ;;  %v443_v36 = vshrl.u32 %v442_v30, 7  ;;  %vm1850_vm5 = vcmask 257024  }
  0x1e   : > { %2053 = vmatpush3.bf16.msra.mxu1 %v2240_v2  ;;  %2046 = vmatprep.subr.bf16.mxu0 %v2320_v1  ;;  %s2443_s25 = scalar_lea.vmem %s2751_s1, %s1930_s20  ;;  %v2248_v11 = vld [vmem:[%s2754_s4 + $0x18] sm:$0xff]   ;;  %v2249_v12 = vld [vmem:[%s2754_s4] sm:$0xff]   ;;  %v2250_v13 = vld [vmem:[%s2754_s4 + $0x10] sm:$0xff]   ;;  %s408_s29 = scalar_lea.vmem %s2762_s12, %s1930_s20 }
  0x1f   : > { %2054 = vmatprep.subr.bf16.mxu1 %v2320_v1  ;;  %2056 = vmatprep.mubr.msk.bf16.mxu1 %vm2321_vm0, %v2320_v1  ;;  %v2450_v7 = vld [vmem:[%s2443_s25] sm:$0xf]  ;;  %v2251_v15 = vld [vmem:[%s2754_s4 + $0x28] sm:$0xff]   ;;  %v2252_v16 = vld [vmem:[%s2754_s4 + $0x38] sm:$0xff]   ;;  %v2579_v44 = vsub.s32 0, %v443_v36 }
  0x20   : > { %v412_v14 = vld [vmem:[%s2443_s25] sm:$0xf]  ;;  %v2254_v18 = vld [vmem:[%s2754_s4 + $0x30] sm:$0xff]   ;;  %v2255_v19 = vld [vmem:[%s2756_s6 + $0x8] sm:$0xff]  }
  0x21   : > { %2047 = vmatpush3.bf16.msra.mxu0 %v2241_v3  ;;  %v2253_v17 = vld [vmem:[%s2754_s4 + $0x20] sm:$0xff]   ;;  %v2257_v21 = vld [vmem:[%s2756_s6 + $0x18] sm:$0xff]   ;;  %v2258_v22 = vld [vmem:[%s2756_s6 + $0x10] sm:$0xff]  }
  0x22   : > { %2055 = vmatpush3.bf16.msra.mxu1 %v2242_v4  ;;  %2060 = vmatprep.subr.bf16.mxu0 %v2320_v1  ;;  %v2256_v20 = vld [vmem:[%s2756_s6] sm:$0xff]   ;;  %v2259_v23 = vld [vmem:[%s2756_s6 + $0x28] sm:$0xff]   ;;  %v2261_v25 = vld [vmem:[%s2756_s6 + $0x38] sm:$0xff]  }
  0x23   : > { %2068 = vmatprep.subr.bf16.mxu1 %v2320_v1  ;;  %v2260_v24 = vld [vmem:[%s2756_s6 + $0x20] sm:$0xff]   ;;  %v2262_v26 = vld [vmem:[%s2756_s6 + $0x30] sm:$0xff]  }
  0x24   : > { %2049 = vmatmul.mubr.msk.bf16.vlgmr.msra.gmra.mxu0 %vm470_vm1, %v2450_v7  ;;  %v686_v35 = vld [vmem:[%s2755_s5] sm:$0x1]  ;;  %v687_v38 = vld [vmem:[%s2755_s5 + $0x1] sm:$0x1]  ;;  %v688_v53 = vld [vmem:[%s2755_s5 + $0x2] sm:$0x1] }
  0x25   : > { %2057 = vmatmul.mubr.msk.bf16.vlgmr.msra.gmra.mxu1 %vm470_vm1, %v2450_v7  ;;  %2061 = vmatpush3.bf16.msra.mxu0 %v2243_v5  ;;  %v690_v41 = vunpack.c.l.bf16 %v686_v35  ;;  %v691_v43 = vunpack.c.l.bf16 %v687_v38  ;;  %v434_v46 = vld [vmem:[%s2753_s3] sm:$0x1]  ;;  %v435_v48 = vld [vmem:[%s2753_s3 + $0x1] sm:$0x1]  ;;  %v689_v56 = vld [vmem:[%s2755_s5 + $0x3] sm:$0x1]  ;;  %v692_v61 = vunpack.c.l.bf16 %v688_v53 }
  0x26   : > { %2069 = vmatpush3.bf16.msra.mxu1 %v2244_v6  ;;  %2062 = vmatprep.subr.bf16.mxu0 %v2320_v1  ;;  %v438_v54 = vunpack.c.l.bf16 %v434_v46  ;;  %v439_v57 = vunpack.c.l.bf16 %v435_v48  ;;  %v693_v0 = vunpack.c.l.bf16 %v689_v56  ;;  %v436_v6 = vld [vmem:[%s2753_s3 + $0x2] sm:$0x1]  ;;  %v938_v48 = vld [vmem:[%s2757_s7 + $0x1] sm:$0x1] }
  0x27   : > { %2070 = vmatprep.subr.bf16.mxu1 %v2320_v1  ;;  %2064 = vmatprep.mubr.msk.bf16.mxu0 %vm2321_vm0, %v2320_v1  ;;  %v697_v50 = vrot.slane %v690_v41, %v2579_v44  ;;  %v701_v52 = vrot.slane %v691_v43, %v2579_v44 }
  0x28   : > { %2072 = vmatprep.mubr.msk.bf16.mxu1 %vm2321_vm0, %v2320_v1  ;;  %v445_v2 = vrot.slane %v438_v54, %v2579_v44  ;;  %v449_v5 = vrot.slane %v439_v57, %v2579_v44 }
  0x29   : > { %2063 = vmatpush3.bf16.msra.mxu0 %v2245_v8 }
  0x2a   : > { %2071 = vmatpush3.bf16.msra.mxu1 %v2246_v9  ;;  %2076 = vmatprep.subr.bf16.mxu0 %v2320_v1 }
  0x2b   : > { %2084 = vmatprep.subr.bf16.mxu1 %v2320_v1 }
  0x2c   : > { %2065 = vmatmul.mubr.msk.bf16.vlgmr.msra.gmra.mxu0 %vm470_vm1, %v2450_v7 }
  0x2d   : > { %2073 = vmatmul.mubr.msk.bf16.vlgmr.msra.gmra.mxu1 %vm470_vm1, %v2450_v7  ;;  %2077 = vmatpush3.bf16.msra.mxu0 %v2247_v10  ;;  %v437_v10 = vld [vmem:[%s2753_s3 + $0x3] sm:$0x1] }
  0x2e   : > { %2085 = vmatpush3.bf16.msra.mxu1 %v2248_v11  ;;  %2078 = vmatprep.subr.bf16.mxu0 %v2320_v1 }
  0x2f   : > { %2086 = vmatprep.subr.bf16.mxu1 %v2320_v1  ;;  %2080 = vmatprep.mubr.msk.bf16.mxu0 %vm2321_vm0, %v2320_v1 }
  0x30   : > { %2088 = vmatprep.mubr.msk.bf16.mxu1 %vm2321_vm0, %v2320_v1 }
  0x31   : > { %2079 = vmatpush3.bf16.msra.mxu0 %v2249_v12 }
  0x32   : > { %2087 = vmatpush3.bf16.msra.mxu1 %v2250_v13  ;;  %2092 = vmatprep.subr.bf16.mxu0 %v2320_v1  ;;  %v705_v13 = vrot.slane %v692_v61, %v2579_v44 }
  0x33   : > { %2100 = vmatprep.subr.bf16.mxu1 %v2320_v1 }
  0x34   : > { %2081 = vmatmul.mubr.msk.bf16.vlgmr.msra.gmra.mxu0 %vm470_vm1, %v412_v14 }
  0x35   : > { %2089 = vmatmul.mubr.msk.bf16.vlgmr.msra.gmra.mxu1 %vm470_vm1, %v412_v14  ;;  %2093 = vmatpush3.bf16.msra.mxu0 %v2251_v15 }
  0x36   : > { %2101 = vmatpush3.bf16.msra.mxu1 %v2252_v16  ;;  %2094 = vmatprep.subr.bf16.mxu0 %v2320_v1  ;;  %v709_v16 = vrot.slane %v693_v0, %v2579_v44 }
  0x37   : > { %2102 = vmatprep.subr.bf16.mxu1 %v2320_v1  ;;  %2096 = vmatprep.mubr.msk.bf16.mxu0 %vm2321_vm0, %v2320_v1 }
  0x38   : > { %2104 = vmatprep.mubr.msk.bf16.mxu1 %vm2321_vm0, %v2320_v1 }
  0x39   : > { %2095 = vmatpush3.bf16.msra.mxu0 %v2253_v17 }
  0x3a   : > { %2103 = vmatpush3.bf16.msra.mxu1 %v2254_v18  ;;  %2108 = vmatprep.subr.bf16.mxu0 %v2320_v1  ;;  %v440_v18 = vunpack.c.l.bf16 %v436_v6 }
  0x3b   : > { %2116 = vmatprep.subr.bf16.mxu1 %v2320_v1 }
  0x3c   : > { %2097 = vmatmul.mubr.msk.bf16.vlgmr.msra.gmra.mxu0 %vm470_vm1, %v412_v14 }
  0x3d   : > { %2105 = vmatmul.mubr.msk.bf16.vlgmr.msra.gmra.mxu1 %vm470_vm1, %v412_v14  ;;  %2112 = vmatprep.mubr.msk.bf16.mxu0 %vm2321_vm0, %v2320_v1 }
  0x3e   : > { %2120 = vmatprep.mubr.msk.bf16.mxu1 %vm2321_vm0, %v2320_v1  ;;  %2109 = vmatpush3.bf16.msra.mxu0 %v2255_v19 }
  0x3f   : > { %2110 = vmatprep.subr.bf16.mxu0 %v2320_v1  ;;  %2117 = vmatpush3.bf16.msra.mxu1 %v2257_v21  ;;  %v441_v21 = vunpack.c.l.bf16 %v437_v10 }
  0x40   : > { %2118 = vmatprep.subr.bf16.mxu1 %v2320_v1 }
  0x42   : > { %2111 = vmatpush3.bf16.msra.mxu0 %v2256_v20 }
  0x43   : > { %2124 = vmatprep.subr.bf16.mxu0 %v2320_v1  ;;  %2119 = vmatpush3.bf16.msra.mxu1 %v2258_v22 }
  0x44   : > { %2132 = vmatprep.subr.bf16.mxu1 %v2320_v1 }
  0x45   : > { %2113 = vmatmul.mubr.msk.bf16.vlgmr.msra.gmra.mxu0 %vm470_vm1, %v412_v14 }
  0x46   : > { %2125 = vmatpush3.bf16.msra.mxu0 %v2259_v23  ;;  %2128 = vmatprep.mubr.msk.bf16.mxu0 %vm2321_vm0, %v2320_v1 }
  0x47   : > { %2126 = vmatprep.subr.bf16.mxu0 %v2320_v1  ;;  %2121 = vmatmul.mubr.msk.bf16.vlgmr.msra.gmra.mxu1 %vm470_vm1, %v412_v14 }
  0x48   : > { %2133 = vmatpush3.bf16.msra.mxu1 %v2261_v25  ;;  %2136 = vmatprep.mubr.msk.bf16.mxu1 %vm2321_vm0, %v2320_v1 }
  0x49   : > { %2134 = vmatprep.subr.bf16.mxu1 %v2320_v1 }
  0x4a   : > { %2127 = vmatpush3.bf16.msra.mxu0 %v2260_v24 }
  0x4b   : > { %2140 = vmatprep.subr.bf16.mxu0 %v2320_v1 }
  0x4c   : > { %2135 = vmatpush3.bf16.msra.mxu1 %v2262_v26 }
  0x4d   : > { %2129 = vmatmul.mubr.msk.bf16.vlgmr.msra.gmra.mxu0 %vm470_vm1, %v412_v14  ;;  %2146 = vmatprep.subr.bf16.mxu1 %v2320_v1 }
  0x4e   : > { %2142 = vmatprep.mubr.msk.bf16.mxu0 %vm2321_vm0, %v2320_v1 }
  0x4f   : > { %2137 = vmatmul.mubr.msk.bf16.vlgmr.msra.gmra.mxu1 %vm470_vm1, %v412_v14 }
  0x50   : > { %2148 = vmatprep.mubr.msk.bf16.mxu1 %vm2321_vm0, %v2320_v1 }
  0xe4   : > { %v508_v27 = vpop.f32.mrf.mxu0 }
  0xe5   : > { %v560_v28 = vpop.f32.mrf.mxu1  ;;  %v509_v17 = vadd.f32 %v508_v27, %v445_v2 }
  0xe6   : > { %v2050_v29 = vpop.f32.mrf.mxu0  ;;  %v561_v20 = vadd.f32 %v560_v28, %v449_v5 }
  0xe7   : > { %v2058_v31 = vpop.f32.mrf.mxu1  ;;  %v1169_v29 = vpack.c.bf16 %v509_v17, %v509_v17 }
  0xe8   : > { %v511_v32 = vpop.f32.mrf.mxu0  ;;  %v453_v31 = vrot.slane %v440_v18, %v2579_v44  ;;  %v1170_v27 = vpack.c.bf16 %v561_v20, %v561_v20 }
  0xe9   : > { %v563_v33 = vpop.f32.mrf.mxu1 }
  0xea   : > { %v2051_v34 = vpop.f32.mrf.mxu0 }
  0xeb   : > { %v2059_v37 = vpop.f32.mrf.mxu1  ;;  %v457_v34 = vrot.slane %v441_v21, %v2579_v44 }
  0xec   : > { %v2575_v39 = vpop.f32.mrf.mxu0 }
  0xed   : > { %v2577_v40 = vpop.f32.mrf.mxu1 }
  0xee   : > { %v2066_v42 = vpop.f32.mrf.mxu0 }
  0xef   : > { %v2074_v45 = vpop.f32.mrf.mxu1  ;;  %v613_v42 = vadd.f32 %v2575_v39, %v453_v31  ;;  %v937_v39 = vld [vmem:[%s2757_s7] sm:$0x1] }
  0xf0   : > { %v615_v47 = vpop.f32.mrf.mxu0  ;;  %v665_v45 = vadd.f32 %v2577_v40, %v457_v34  ;;  %v941_v40 = vunpack.c.l.bf16 %v937_v39 }
  0xf1   : > { %v667_v49 = vpop.f32.mrf.mxu1  ;;  %v1171_v46 = vpack.c.bf16 %v613_v42, %v613_v42 }
  0xf2   : > { %v2067_v51 = vpop.f32.mrf.mxu0  ;;  %v1172_v47 = vpack.c.bf16 %v665_v45, %v665_v45  ;;  %v948_v49 = vrot.slane %v941_v40, %v2579_v44 }
  0xf3   : > { %v2075_v55 = vpop.f32.mrf.mxu1 }
  0xf4   : > { %v759_v58 = vpop.f32.mrf.mxu0 }
  0xf5   : > { %v760_v59 = vadd.f32 %v759_v58, %v697_v50  ;;  %v811_v60 = vpop.f32.mrf.mxu1  ;;  %v942_v50 = vunpack.c.l.bf16 %v938_v48 }
  0xf6   : > { %v812_v62 = vadd.f32 %v811_v60, %v701_v52  ;;  %v2082_v63 = vpop.f32.mrf.mxu0 }
  0xf7   : > { %v1173_v3 = vpack.c.bf16 %v760_v59, %v760_v59  ;;  %v2090_v4 = vpop.f32.mrf.mxu1  ;;  %v952_v53 = vrot.slane %v942_v50, %v2579_v44 }
  0xf8   : > { %v1174_v8 = vpack.c.bf16 %v812_v62, %v812_v62  ;;  %v762_v9 = vpop.f32.mrf.mxu0 }
  0xf9   : > { %v1182_v11 = vsel %vm1177_vm2, %v1173_v3, 0  ;;  %v814_v12 = vpop.f32.mrf.mxu1 }
  0xfa   : > { %v1228_v14 = vsel %vm1177_vm2, %v1174_v8, 0  ;;  %v2083_v15 = vpop.f32.mrf.mxu0  ;;  %2141 = vmatpush3.bf16.xpose.msra.mxu0 %v1182_v11  ;;  %v1367_v12 = vand.u32 127, %v442_v30 }
  0xfb   : > { %v2091_v19 = vpop.f32.mrf.mxu1  ;;  %2147 = vmatpush3.bf16.xpose.msra.mxu1 %v1228_v14  ;;  %2152 = vmatprep.subr.bf16.mxu0 %v2320_v1 }
  0xfc   : > { %v863_v22 = vpop.f32.mrf.mxu0  ;;  %2158 = vmatprep.subr.bf16.mxu1 %v2320_v1 }
  0xfd   : > { %v864_v23 = vadd.f32 %v863_v22, %v705_v13  ;;  %v915_v24 = vpop.f32.mrf.mxu1  ;;  %v1368_v13 = vstv %s411_s17 }
  0xfe   : > { %v916_v25 = vadd.f32 %v915_v24, %v709_v16  ;;  %v2098_v26 = vpop.f32.mrf.mxu0  ;;  %vm2647_vm4 = vcmp.lt.s32.totalorder %v1367_v12, %v1368_v13 }
  0xff   : > { %v1175_v32 = vpack.c.bf16 %v864_v23, %v864_v23  ;;  %v2106_v33 = vpop.f32.mrf.mxu1 }
 0x100   : > { %v1176_v35 = vpack.c.bf16 %v916_v25, %v916_v25  ;;  %v866_v36 = vpop.f32.mrf.mxu0 }
 0x101   : > { %v1274_v28 = vsel %vm1177_vm2, %v1175_v32, 0  ;;  %v918_v37 = vpop.f32.mrf.mxu1  ;;  %2143 = vmatmul.mubr.msk.bf16.vlgmr.msra.gmra.mxu0 %vm1177_vm2, %v1169_v29 }
 0x102   : > { %v1320_v38 = vsel %vm1177_vm2, %v1176_v35, 0  ;;  %2149 = vmatmul.mubr.msk.bf16.vlgmr.msra.gmra.mxu1 %vm1177_vm2, %v1170_v27  ;;  %v2099_v41 = vpop.f32.mrf.mxu0  ;;  %2153 = vmatpush3.bf16.xpose.msra.mxu0 %v1274_v28 }
 0x103   : > { %v2107_v43 = vpop.f32.mrf.mxu1  ;;  %2159 = vmatpush3.bf16.xpose.msra.mxu1 %v1320_v38  ;;  %2154 = vmatprep.mubr.msk.bf16.mxu0 %vm2321_vm0, %v2320_v1 }
 0x104   : > { %2160 = vmatprep.mubr.msk.bf16.mxu1 %vm2321_vm0, %v2320_v1  ;;  %2164 = vmatprep.subr.bf16.mxu0 %v2320_v1 }
 0x105   : > { %2170 = vmatprep.subr.bf16.mxu1 %v2320_v1  ;;  %v1007_v51 = vpop.f32.mrf.mxu0 }
 0x106   : > { %v1008_v52 = vadd.f32 %v1007_v51, %v948_v49 }
 0x107   : > { %v2114_v54 = vpop.f32.mrf.mxu0  ;;  %v1059_v57 = vpop.f32.mrf.mxu1 }
 0x108   : > { %v1422_v55 = vpack.c.bf16 %v1008_v52, %v1008_v52  ;;  %v1060_v59 = vadd.f32 %v1059_v57, %v952_v53 }
 0x109   : > { %2155 = vmatmul.mubr.msk.bf16.vlgmr.msra.gmra.mxu0 %vm1177_vm2, %v1171_v46  ;;  %v1010_v56 = vpop.f32.mrf.mxu0  ;;  %v2122_v61 = vpop.f32.mrf.mxu1 }
 0x10a   : > { %2161 = vmatmul.mubr.msk.bf16.vlgmr.msra.gmra.mxu1 %vm1177_vm2, %v1172_v47  ;;  %2166 = vmatprep.mubr.msk.bf16.mxu0 %vm2321_vm0, %v2320_v1  ;;  %v1431_v58 = vsel %vm1429_vm3, %v1422_v55, 0  ;;  %v1423_v62 = vpack.c.bf16 %v1060_v59, %v1060_v59 }
 0x10b   : > { %2172 = vmatprep.mubr.msk.bf16.mxu1 %vm2321_vm0, %v2320_v1  ;;  %v2115_v60 = vpop.f32.mrf.mxu0  ;;  %2165 = vmatpush3.bf16.msra.mxu0 %v1431_v58  ;;  %v1062_v63 = vpop.f32.mrf.mxu1 }
 0x10c   : > { %2176 = vmatprep.subr.bf16.mxu0 %v2320_v1  ;;  %v1477_v2 = vsel %vm1429_vm3, %v1423_v62, 0 }
 0x10d   : > { %v2639_v0 = vpop.f32.mrf.mxu0  ;;  %v2123_v3 = vpop.f32.mrf.mxu1  ;;  %2171 = vmatpush3.bf16.msra.mxu1 %v1477_v2  ;;  %v939_v2 = vld [vmem:[%s2757_s7 + $0x2] sm:$0x1] }
 0x10e   : > { %2182 = vmatprep.subr.bf16.mxu1 %v2320_v1 }
 0x10f   : > { %v2130_v4 = vpop.f32.mrf.mxu0  ;;  %v2643_v6 = vpop.f32.mrf.mxu1 }
 0x110   : > { %v943_v4 = vunpack.c.l.bf16 %v939_v2 }
 0x111   : > { %v1114_v5 = vpop.f32.mrf.mxu0  ;;  %v2138_v9 = vpop.f32.mrf.mxu1 }
 0x112   : > { %v940_v5 = vld [vmem:[%s2757_s7 + $0x3] sm:$0x1]  ;;  %v956_v9 = vrot.slane %v943_v4, %v2579_v44 }
 0x113   : > { %v2131_v8 = vpop.f32.mrf.mxu0  ;;  %v1166_v10 = vpop.f32.mrf.mxu1 }
 0x114   : > { %v944_v10 = vunpack.c.l.bf16 %v940_v5  ;;  %v1112_v12 = vadd.f32 %v2639_v0, %v956_v9 }
 0x115   : > { %v2139_v11 = vpop.f32.mrf.mxu1 }
 0x116   : > { %v960_v13 = vrot.slane %v944_v10, %v2579_v44 }
 0x1c1   : > { %v1218_v14 = vpop.f32.mrf.mxu0 }
 0x1c2   : > { %v1362_v16 = vmul.f32 0.35355338, %v1218_v14  ;;  %v1264_v17 = vpop.f32.mrf.mxu1 }
 0x1c3   : > { %v1363_v18 = vmul.f32 0.35355338, %v1264_v17  ;;  %v2144_v19 = vpop.f32.mrf.mxu0  ;;  %v1164_v17 = vadd.f32 %v2643_v6, %v960_v13  ;;  %v1615_v6 = vld [vmem:[%s2758_s8] sm:$0xf] }
 0x1c4   : > { %v2150_v20 = vpop.f32.mrf.mxu1  ;;  %v1370_v21 = vsel %vm2647_vm4, %v1362_v16, -10000.0  ;;  %v1424_v16 = vpack.c.bf16 %v1112_v12, %v1112_v12 }
 0x1c5   : > { %v1221_v22 = vpop.f32.mrf.mxu0  ;;  %v1374_v23 = vsel %vm1177_vm2, %v1370_v21, -inf  ;;  %v1371_v30 = vsel %vm2647_vm4, %v1363_v18, -10000.0 }
 0x1c6   : > { %v1267_v24 = vpop.f32.mrf.mxu1  ;;  %1375 = vmax.xlane.f32.xlu0 %v1374_v23  ;;  %v1377_v31 = vsel %vm1177_vm2, %v1371_v30, -inf  ;;  %v1425_v22 = vpack.c.bf16 %v1164_v17, %v1164_v17 }
 0x1c7   : > { %v2145_v25 = vpop.f32.mrf.mxu0 }
 0x1c8   : > { %v2151_v26 = vpop.f32.mrf.mxu1 }
 0x1c9   : > { %v1310_v29 = vpop.f32.mrf.mxu0 }
 0x1ca   : > { %v1364_v32 = vmul.f32 0.35355338, %v1310_v29  ;;  %v1356_v33 = vpop.f32.mrf.mxu1  ;;  %1378 = vmax.xlane.f32.xlu0 %v1377_v31  ;;  %v1623_v29 = vsel %vm1429_vm3, %v1615_v6, 0 }
 0x1cb   : > { %v1365_v27 = vmul.f32 0.35355338, %v1356_v33  ;;  %v2156_v34 = vpop.f32.mrf.mxu0 }
 0x1cc   : > { %v2162_v35 = vpop.f32.mrf.mxu1  ;;  %v1372_v36 = vsel %vm2647_vm4, %v1364_v32, -10000.0 }
 0x1cd   : > { %v1313_v28 = vpop.f32.mrf.mxu0  ;;  %v1380_v37 = vsel %vm1177_vm2, %v1372_v36, -inf  ;;  %v1373_v41 = vsel %vm2647_vm4, %v1365_v27, -10000.0  ;;  %v1616_v27 = vld [vmem:[%s2758_s8 + $0x4] sm:$0xf]  ;;  %v1617_v35 = vld [vmem:[%s2758_s8 + $0x8] sm:$0xf] }
 0x1ce   : > { %v1359_v38 = vpop.f32.mrf.mxu1  ;;  %1381 = vmax.xlane.f32.xlu1 %v1380_v37  ;;  %v1383_v45 = vsel %vm1177_vm2, %v1373_v41, -inf  ;;  %v1669_v34 = vsel %vm1429_vm3, %v1616_v27, 0  ;;  %v1715_v37 = vsel %vm1429_vm3, %v1617_v35, 0 }
 0x1cf   : > { %v2157_v42 = vpop.f32.mrf.mxu0 }
 0x1d0   : > { %v2163_v43 = vpop.f32.mrf.mxu1 }
 0x1d2   : > { %1384 = vmax.xlane.f32.xlu1 %v1383_v45 }
 0x24f   : > { %v1376_v46 = vpop.xlane.xlu0 %1375 }
 0x250   : > { %v1386_v47 = vsub.f32 %v1370_v21, %v1376_v46  ;;  %v1523_v21 = vsel %vm1429_vm3, %v1424_v16, 0 }
 0x252   : > { %v1390_v39 = vmul.f32 1.442695, %v1386_v47 }
 0x253   : > { %v1379_v40 = vpop.xlane.xlu0 %1378 }
 0x254   : > { %2263 = vpow2.f32 %v1390_v39  ;;  %v1387_v48 = vsub.f32 %v1371_v30, %v1379_v40  ;;  %v1569_v30 = vsel %vm1429_vm3, %v1425_v22, 0  ;;  %v1817_v22 = vunpack.c.l.bf16 %v2450_v7 }
 0x256   : > { %v1392_v49 = vmul.f32 1.442695, %v1387_v48 }
 0x257   : > { %v1382_v50 = vpop.xlane.xlu1 %1381 }
 0x258   : > { %2265 = vpow2.f32 %v1392_v49  ;;  %v1388_v51 = vsub.f32 %v1372_v36, %v1382_v50 }
 0x25a   : > { %v1394_v52 = vmul.f32 1.442695, %v1388_v51 }
 0x25b   : > { %v1385_v53 = vpop.xlane.xlu1 %1384 }
 0x25c   : > { %2267 = vpow2.f32 %v1394_v52  ;;  %v1389_v54 = vsub.f32 %v1373_v41, %v1385_v53  ;;  %v1618_v41 = vld [vmem:[%s2758_s8 + $0xc] sm:$0xf] }
 0x25d   : > { %v1761_v46 = vsel %vm1429_vm3, %v1618_v41, 0 }
 0x25e   : > { %v1396_v55 = vmul.f32 1.442695, %v1389_v54 }
 0x260   : > { %2269 = vpow2.f32 %v1396_v55 }
 0x261   : > { %v2264_v56 = vpop.eup %2263 }
 0x262   : > { %v1398_v57 = vsel %vm1177_vm2, %v2264_v56, 0.0 }
 0x263   : > { %1399 = vadd.xlane.f32.xlu0 %v1398_v57 }
 0x265   : > { %v2266_v58 = vpop.eup %2265 }
 0x266   : > { %v1401_v59 = vsel %vm1177_vm2, %v2266_v58, 0.0 }
 0x267   : > { %1402 = vadd.xlane.f32.xlu1 %v1401_v59 }
 0x269   : > { %v2268_v60 = vpop.eup %2267 }
 0x26a   : > { %v1404_v61 = vsel %vm1177_vm2, %v2268_v60, 0.0 }
 0x26b   : > { %1405 = vadd.xlane.f32.xlu0 %v1404_v61 }
 0x26d   : > { %v2270_v62 = vpop.eup %2269 }
 0x26e   : > { %v1407_v63 = vsel %vm1177_vm2, %v2270_v62, 0.0 }
 0x26f   : > { %1408 = vadd.xlane.f32.xlu1 %v1407_v63 }
 0x2ec   : > { %v1400_v3 = vpop.xlane.xlu0 %1399 }
 0x2ed   : > { %2271 = vrcp.f32 %v1400_v3 }
 0x2f0   : > { %v1403_v8 = vpop.xlane.xlu1 %1402 }
 0x2f1   : > { %2273 = vrcp.f32 %v1403_v8 }
 0x2f4   : > { %v1406_v11 = vpop.xlane.xlu0 %1405 }
 0x2f5   : > { %2275 = vrcp.f32 %v1406_v11 }
 0x2f8   : > { %v1409_v14 = vpop.xlane.xlu1 %1408 }
 0x2f9   : > { %2277 = vrcp.f32 %v1409_v14 }
 0x2fa   : > { %v2272_v15 = vpop.eup %2271 }
 0x2fb   : > { %v1414_v18 = vmul.f32 %v2272_v15, %v2264_v56 }
 0x2fd   : > { %v1418_v19 = vpack.c.bf16 %v1414_v18, %v1414_v18 }
 0x2fe   : > { %v2274_v20 = vpop.eup %2273 }
 0x2ff   : > { %2167 = vmatmul.mubr.msk.bf16.vlgmr.msra.gmra.mxu0 %vm1177_vm2, %v1418_v19  ;;  %v1415_v23 = vmul.f32 %v2274_v20, %v2266_v58 }
 0x300   : > { %2177 = vmatpush3.bf16.msra.mxu0 %v1523_v21  ;;  %2178 = vmatprep.mubr.msk.bf16.mxu0 %vm2321_vm0, %v2320_v1 }
 0x301   : > { %v1419_v0 = vpack.c.bf16 %v1415_v23, %v1415_v23  ;;  %2188 = vmatprep.subr.bf16.mxu0 %v2320_v1 }
 0x302   : > { %v2276_v24 = vpop.eup %2275 }
 0x303   : > { %2173 = vmatmul.mubr.msk.bf16.vlgmr.msra.gmra.mxu1 %vm1177_vm2, %v1419_v0  ;;  %v1416_v25 = vmul.f32 %v2276_v24, %v2268_v60 }
 0x304   : > { %2183 = vmatpush3.bf16.msra.mxu1 %v1569_v30  ;;  %2184 = vmatprep.mubr.msk.bf16.mxu1 %vm2321_vm0, %v2320_v1 }
 0x305   : > { %v1420_v26 = vpack.c.bf16 %v1416_v25, %v1416_v25  ;;  %2194 = vmatprep.subr.bf16.mxu1 %v2320_v1 }
 0x306   : > { %v2278_v31 = vpop.eup %2277 }
 0x307   : > { %2179 = vmatmul.mubr.msk.bf16.vlgmr.msra.gmra.mxu0 %vm1177_vm2, %v1420_v26  ;;  %v1417_v32 = vmul.f32 %v2278_v31, %v2270_v62 }
 0x308   : > { %2189 = vmatpush3.bf16.msra.mxu0 %v1623_v29  ;;  %2190 = vmatprep.mubr.msk.bf16.mxu0 %vm2321_vm0, %v2320_v1 }
 0x309   : > { %v1421_v33 = vpack.c.bf16 %v1417_v32, %v1417_v32  ;;  %2200 = vmatprep.subr.bf16.mxu0 %v2320_v1 }
 0x30b   : > { %2185 = vmatmul.mubr.msk.bf16.vlgmr.msra.gmra.mxu1 %vm1177_vm2, %v1421_v33 }
 0x30c   : > { %2196 = vmatprep.mubr.msk.bf16.mxu1 %vm2321_vm0, %v2320_v1  ;;  %2195 = vmatpush3.bf16.msra.mxu1 %v1669_v34  ;;  %v1980_v34 = vld [vmem:[%s2760_s10] ss:$0 sm:$0xff] }
 0x30d   : > { %2206 = vmatprep.subr.bf16.mxu1 %v2320_v1 }
 0x3bf   : > { %v1467_v36 = vpop.f32.mrf.mxu0 }
 0x3c0   : > { %v1611_v28 = vpack.c.bf16 %v1467_v36, %v1467_v36  ;;  %v1981_v36 = vld [vmem:[%s2761_s11] ss:$0 sm:$0xff] }
 0x3c1   : > { %v2168_v38 = vpop.f32.mrf.mxu0 }
 0x3c2   : > { %2191 = vmatmul.mubr.msk.bf16.vlgmr.msra.gmra.mxu0 %vm1177_vm2, %v1611_v28 }
 0x3c3   : > { %v1470_v42 = vpop.f32.mrf.mxu0  ;;  %v1513_v43 = vpop.f32.mrf.mxu1  ;;  %2201 = vmatpush3.bf16.msra.mxu0 %v1715_v37  ;;  %2202 = vmatprep.mubr.msk.bf16.mxu0 %vm2321_vm0, %v2320_v1 }
 0x3c4   : > { %v1612_v45 = vpack.c.bf16 %v1513_v43, %v1513_v43 }
 0x3c5   : > { %v2169_v47 = vpop.f32.mrf.mxu0  ;;  %v2174_v39 = vpop.f32.mrf.mxu1 }
 0x3c6   : > { %2197 = vmatmul.mubr.msk.bf16.vlgmr.msra.gmra.mxu1 %vm1177_vm2, %v1612_v45 }
 0x3c7   : > { %v1516_v40 = vpop.f32.mrf.mxu1  ;;  %v1559_v48 = vpop.f32.mrf.mxu0  ;;  %2207 = vmatpush3.bf16.msra.mxu1 %v1761_v46  ;;  %2208 = vmatprep.mubr.msk.bf16.mxu1 %vm2321_vm0, %v2320_v1  ;;  %v1810_v1 = vld [vmem:[%s2759_s9] sm:$0x1] }
 0x3c8   : > { %v1613_v49 = vpack.c.bf16 %v1559_v48, %v1559_v48  ;;  %v1811_v8 = vunpack.c.l.bf16 %v1810_v1 }
 0x3c9   : > { %v2175_v50 = vpop.f32.mrf.mxu1  ;;  %v2180_v51 = vpop.f32.mrf.mxu0 }
 0x3ca   : > { %2203 = vmatmul.mubr.msk.bf16.vlgmr.msra.gmra.mxu0 %vm1177_vm2, %v1613_v49  ;;  %v1815_v17 = vrot.slane %v1811_v8, %v2579_v44 }
 0x3cb   : > { %v1562_v52 = vpop.f32.mrf.mxu0  ;;  %v1605_v53 = vpop.f32.mrf.mxu1 }
 0x3cc   : > { %v1614_v54 = vpack.c.bf16 %v1605_v53, %v1605_v53 }
 0x3cd   : > { %v2181_v55 = vpop.f32.mrf.mxu0  ;;  %v2186_v56 = vpop.f32.mrf.mxu1 }
 0x3ce   : > { %2209 = vmatmul.mubr.msk.bf16.vlgmr.msra.gmra.mxu1 %vm1177_vm2, %v1614_v54 }
 0x3cf   : > { %v1608_v57 = vpop.f32.mrf.mxu1 }
 0x3d1   : > { %v2187_v58 = vpop.f32.mrf.mxu1 }
 0x482   : > { %v1659_v59 = vpop.f32.mrf.mxu0 }
 0x483   : > { %v1803_v9 = vsel %vm470_vm1, %v1659_v59, 0.0 }
 0x484   : > { %v2192_v60 = vpop.f32.mrf.mxu0 }
 0x486   : > { %v1662_v61 = vpop.f32.mrf.mxu0  ;;  %v1705_v62 = vpop.f32.mrf.mxu1 }
 0x487   : > { %v1804_v3 = vsel %vm470_vm1, %v1705_v62, 0.0 }
 0x488   : > { %v2193_v63 = vpop.f32.mrf.mxu0  ;;  %v2198_v2 = vpop.f32.mrf.mxu1  ;;  %v1805_v11 = vadd.f32 %v1804_v3, %v1803_v9 }
 0x48a   : > { %v1708_v4 = vpop.f32.mrf.mxu1  ;;  %v1751_v5 = vpop.f32.mrf.mxu0 }
 0x48b   : > { %v1806_v10 = vsel %vm470_vm1, %v1751_v5, 0.0 }
 0x48c   : > { %v2199_v12 = vpop.f32.mrf.mxu1  ;;  %v2204_v13 = vpop.f32.mrf.mxu0  ;;  %v1807_v14 = vadd.f32 %v1806_v10, %v1805_v11 }
 0x48e   : > { %v1754_v15 = vpop.f32.mrf.mxu0  ;;  %v1797_v16 = vpop.f32.mrf.mxu1 }
 0x48f   : > { %v1808_v18 = vsel %vm470_vm1, %v1797_v16, 0.0 }
 0x490   : > { %v1809_v19 = vadd.f32 %v1808_v18, %v1807_v14  ;;  %v2205_v20 = vpop.f32.mrf.mxu0  ;;  %v2210_v21 = vpop.f32.mrf.mxu1 }
 0x492   : > { %v1816_v23 = vadd.f32 %v1815_v17, %v1809_v19  ;;  %v1800_v0 = vpop.f32.mrf.mxu1 }
 0x494   : > { %v2211_v24 = vpop.f32.mrf.mxu1  ;;  %v1818_v6 = vadd.f32 %v1817_v22, %v1816_v23 }
 0x496   : > { %v1819_v30 = vsel %vm470_vm1, %v1818_v6, 0.0 }
 0x497   : > { %1820 = vadd.xlane.f32.xlu0 %v1819_v30 }
 0x520   : > { %v1821_v25 = vpop.xlane.xlu0 %1820 }
 0x521   : > { %v1823_v26 = vmul.f32 0.03125, %v1821_v25 }
 0x523   : > { %v1824_v29 = vsub.f32 %v1818_v6, %v1823_v26 }
 0x525   : > { %v1825_v31 = vmul.f32 %v1824_v29, %v1824_v29 }
 0x527   : > { %v1826_v44 = vsel %vm470_vm1, %v1825_v31, 0.0 }
 0x528   : > { %1827 = vadd.xlane.f32.xlu1 %v1826_v44 }
 0x5b1   : > { %v1828_v32 = vpop.xlane.xlu1 %1827 }
 0x5b2   : > { %v1829_v33 = vmul.f32 0.03125, %v1828_v32 }
 0x5b4   : > { %v1830_v27 = vadd.f32 1e-12, %v1829_v33 }
 0x5b6   : > { %2279 = vrsqrt.f32 %v1830_v27 }
 0x5c3   : > { %v2280_v7 = vpop.eup %2279 }
 0x5c4   : > { %v1832_v35 = vmul.f32 %v2280_v7, %v1824_v29 }
 0x5c6   : > { %v1840_v28 = vmul.f32 %v1980_v34, %v1832_v35 }
 0x5c8   : > { %v1848_v37 = vadd.f32 %v1981_v36, %v1840_v28 }
 0x5ca   : > { %v1849_v38 = vpack.c.bf16 %v1848_v37, %v1848_v37 }
 0x5cc   : > { %1851 = vst.msk [vmem:[%s408_s29] sm:$0xf] %vm1850_vm5, %v1849_v38 }
 0x5cd PF: > { %s28_s28 = sadd.s32 1, %s2317_s28   ;;  %s2765_s26 = smov %s2313_s27 }
 0x5ce   : > { %p25_p10 = scmp.ge.s32.totalorder %s28_s28, 4   ;;  %s2766_s27 = smov %s2768_s0 }
 0x5d0   :  { %27 = sbr.rel (!%p25_p10) target bundleno = 17 (0x11), region = 95 }

</bundles_post_ra>
